<compile_context>
chip_gen: v5e
topology: v5e:2x2
jax: 0.10.0
libtpu: 0.0.40
codegen_flags: <defaults>
</compile_context>

<pallas_src>
import jax
import jax.numpy as jnp
from jax.experimental import pallas as pl
from jax.experimental.pallas import tpu as pltpu

H1 = 128
H2 = 256


def _mlp_kernel(x_ref, w1_ref, b1_ref, w2_ref, b2_ref, w3_ref, b3_ref, o_ref):
    # x_ref: (TN, 3) f32
    # w1: (3, H1) f32, b1: (1, H1) f32          -> layer 1 on the VPU (K=3 is MXU waste)
    # w2: (H1, H2) bf16, b2: (1, H2) f32        -> MXU, f32 accumulate
    # w3: (H2, F) bf16,  b3: (1, F) f32         -> MXU, f32 accumulate
    # o_ref: (TN, F) f32
    x = x_ref[...]

    # Layer 1: 3-term broadcast FMA on the VPU, bias fused into the chain.
    h = (x[:, 0:1] * w1_ref[0:1, :]
         + x[:, 1:2] * w1_ref[1:2, :]
         + x[:, 2:3] * w1_ref[2:3, :]
         + b1_ref[...])
    h = jnp.maximum(h, 0.0)

    # Layer 2: bf16 operands, f32 accumulation on the MXU.
    h = jnp.dot(h.astype(jnp.bfloat16), w2_ref[...],
                preferred_element_type=jnp.float32) + b2_ref[...]
    h = jnp.maximum(h, 0.0)

    # Layer 3: bf16 operands, f32 accumulation on the MXU.
    out = jnp.dot(h.astype(jnp.bfloat16), w3_ref[...],
                  preferred_element_type=jnp.float32) + b3_ref[...]
    o_ref[...] = out.astype(o_ref.dtype)


def teacher_net_forward(pos, params, *, tile_n=1024):
    """pos: [N, 3] float32 point positions. Returns [N, feature_dim] float32.

    tile_n: rows of points per grid step (multiple of 8; sweep 512-2048).
    N is padded up to a multiple of tile_n inside the wrapper, so any N works.
    """
    w1, b1, w2, b2, w3, b3 = params
    N, C = pos.shape
    assert C == 3
    assert tile_n % 8 == 0
    feature_dim = w3.shape[1]

    # bf16 weights for the two large matmuls (halves weight DMA; f32 accumulate in-kernel).
    w2_bf = w2.astype(jnp.bfloat16)
    w3_bf = w3.astype(jnp.bfloat16)

    # Pad the point dimension so the grid divides evenly (zero rows are harmless).
    n_steps = pl.cdiv(N, tile_n)
    n_pad = n_steps * tile_n
    if n_pad != N:
        pos = jnp.pad(pos, ((0, n_pad - N), (0, 0)))

    full = lambda i: (0, 0)  # weights/biases: same (whole) block every grid step

    out = pl.pallas_call(
        _mlp_kernel,
        out_shape=jax.ShapeDtypeStruct((n_pad, feature_dim), jnp.float32),
        grid_spec=pltpu.PrefetchScalarGridSpec(
            num_scalar_prefetch=0,
            grid=(n_steps,),
            in_specs=[
                pl.BlockSpec((tile_n, 3), lambda i: (i, 0)),      # x tile (streamed)
                pl.BlockSpec((3, H1), full),                      # W1 (f32, VPU path)
                pl.BlockSpec((1, H1), full),                      # b1
                pl.BlockSpec((H1, H2), full),                     # W2 (bf16)
                pl.BlockSpec((1, H2), full),                      # b2
                pl.BlockSpec((H2, feature_dim), full),            # W3 (bf16)
                pl.BlockSpec((1, feature_dim), full),             # b3
            ],
            out_specs=pl.BlockSpec((tile_n, feature_dim), lambda i: (i, 0)),
        ),
        compiler_params=pltpu.CompilerParams(
            dimension_semantics=("parallel",)  # point tiles are independent -> megacore shards
        ),
    )(pos, w1, b1, w2_bf, b2, w3_bf, b3)

    return out[:N] if n_pad != N else out


def init_params(key, feature_dim):
    """Deterministic synthetic init (matches PyTorch Linear shapes; stored transposed [in,out])."""
    ks = jax.random.split(key, 6)

    def lin(kw, kb, fan_in, fan_out):
        bound = 1.0 / jnp.sqrt(fan_in)
        w = jax.random.uniform(kw, (fan_in, fan_out), jnp.float32, -bound, bound)
        b = jax.random.uniform(kb, (1, fan_out), jnp.float32, -bound, bound)
        return w, b

    w1, b1 = lin(ks[0], ks[1], 3, H1)
    w2, b2 = lin(ks[2], ks[3], H1, H2)
    w3, b3 = lin(ks[4], ks[5], H2, feature_dim)
    return (w1, b1, w2, b2, w3, b3)


def _reference(pos, params):
    w1, b1, w2, b2, w3, b3 = params
    h = jnp.maximum(pos @ w1 + b1, 0.0)
    h = jnp.maximum(h @ w2 + b2, 0.0)
    return h @ w3 + b3


if __name__ == "__main__":
    key = jax.random.PRNGKey(0)
    k_pos, k_params = jax.random.split(key)

    feature_dim = 64   # NB: F=64 (<128) causes masked output stores; fixed by the model spec.
    N = 1000           # not a multiple of tile_n -> exercises the padding path
    pos = jax.random.normal(k_pos, (N, 3), dtype=jnp.float32)

    params = init_params(k_params, feature_dim)

    # Small tile for the small self-test (gives 4 grid steps); production default is 1024.
    out = teacher_net_forward(pos, params, tile_n=256)
    out = jax.block_until_ready(out)

    ref = _reference(pos, params)
    assert out.shape == (N, feature_dim)
    # bf16 operands on layers 2/3 (f32 accumulate) -> loosen tolerance vs f32 reference.
    assert jnp.allclose(out, ref, atol=3e-2, rtol=3e-2), "mismatch vs JAX reference"

    print("KERNEL_OK")
</pallas_src>

<mosaic_0001>
module attributes {stable_mosaic.version = 11 : i64} {
  func.func @_mlp_kernel(%arg0: i32, %arg1: memref<256x3xf32, #tpu.memory_space<vmem>>, %arg2: memref<3x128xf32, #tpu.memory_space<vmem>>, %arg3: memref<1x128xf32, #tpu.memory_space<vmem>>, %arg4: memref<128x256xbf16, #tpu.memory_space<vmem>>, %arg5: memref<1x256xf32, #tpu.memory_space<vmem>>, %arg6: memref<256x64xbf16, #tpu.memory_space<vmem>>, %arg7: memref<1x64xf32, #tpu.memory_space<vmem>>, %arg8: memref<256x64xf32, #tpu.memory_space<vmem>>) attributes {dimension_semantics = [#tpu.dimension_semantics<parallel>], iteration_bounds = array<i64: 4>, scalar_prefetch = 0 : i64, scratch_operands = 0 : i64, tpu.core_type = #tpu.core_type<tc>, window_params = [{transform_indices = @transform_0, window_bounds = array<i64: 256, 3>}, {pipeline_mode = #tpu.pipeline_mode<synchronous>, transform_indices = @transform_1, window_bounds = array<i64: 3, 128>}, {pipeline_mode = #tpu.pipeline_mode<synchronous>, transform_indices = @transform_2, window_bounds = array<i64: 1, 128>}, {pipeline_mode = #tpu.pipeline_mode<synchronous>, transform_indices = @transform_3, window_bounds = array<i64: 128, 256>}, {pipeline_mode = #tpu.pipeline_mode<synchronous>, transform_indices = @transform_4, window_bounds = array<i64: 1, 256>}, {pipeline_mode = #tpu.pipeline_mode<synchronous>, transform_indices = @transform_5, window_bounds = array<i64: 256, 64>}, {pipeline_mode = #tpu.pipeline_mode<synchronous>, transform_indices = @transform_6, window_bounds = array<i64: 1, 64>}, {transform_indices = @transform_7, window_bounds = array<i64: 256, 64>}]} {
    %c0 = arith.constant 0 : index
    %c0_0 = arith.constant 0 : index
    %0 = vector.load %arg1[%c0, %c0_0] : memref<256x3xf32, #tpu.memory_space<vmem>>, vector<256x3xf32>
    %1 = vector.extract_strided_slice %0 {offsets = [0, 0], sizes = [256, 1], strides = [1, 1]} : vector<256x3xf32> to vector<256x1xf32>
    %c0_1 = arith.constant 0 : index
    %c0_2 = arith.constant 0 : index
    %2 = vector.load %arg2[%c0_1, %c0_2] : memref<3x128xf32, #tpu.memory_space<vmem>>, vector<1x128xf32>
    %3 = vector.broadcast %1 : vector<256x1xf32> to vector<256x128xf32>
    %4 = vector.broadcast %2 : vector<1x128xf32> to vector<256x128xf32>
    %5 = arith.mulf %3, %4 : vector<256x128xf32>
    %6 = vector.extract_strided_slice %0 {offsets = [0, 1], sizes = [256, 1], strides = [1, 1]} : vector<256x3xf32> to vector<256x1xf32>
    %c1 = arith.constant 1 : index
    %c0_3 = arith.constant 0 : index
    %7 = vector.load %arg2[%c1, %c0_3] : memref<3x128xf32, #tpu.memory_space<vmem>>, vector<1x128xf32>
    %8 = vector.broadcast %6 : vector<256x1xf32> to vector<256x128xf32>
    %9 = vector.broadcast %7 : vector<1x128xf32> to vector<256x128xf32>
    %10 = arith.mulf %8, %9 : vector<256x128xf32>
    %11 = arith.addf %5, %10 : vector<256x128xf32>
    %12 = vector.extract_strided_slice %0 {offsets = [0, 2], sizes = [256, 1], strides = [1, 1]} : vector<256x3xf32> to vector<256x1xf32>
    %c2 = arith.constant 2 : index
    %c0_4 = arith.constant 0 : index
    %13 = vector.load %arg2[%c2, %c0_4] : memref<3x128xf32, #tpu.memory_space<vmem>>, vector<1x128xf32>
    %14 = vector.broadcast %12 : vector<256x1xf32> to vector<256x128xf32>
    %15 = vector.broadcast %13 : vector<1x128xf32> to vector<256x128xf32>
    %16 = arith.mulf %14, %15 : vector<256x128xf32>
    %17 = arith.addf %11, %16 : vector<256x128xf32>
    %c0_5 = arith.constant 0 : index
    %c0_6 = arith.constant 0 : index
    %18 = vector.load %arg3[%c0_5, %c0_6] : memref<1x128xf32, #tpu.memory_space<vmem>>, vector<1x128xf32>
    %19 = vector.broadcast %18 : vector<1x128xf32> to vector<256x128xf32>
    %20 = arith.addf %17, %19 : vector<256x128xf32>
    %cst = arith.constant 0.000000e+00 : f32
    %21 = vector.broadcast %cst : f32 to vector<256x128xf32>
    %22 = arith.maximumf %20, %21 : vector<256x128xf32>
    %23 = arith.truncf %22 : vector<256x128xf32> to vector<256x128xbf16>
    %c0_7 = arith.constant 0 : index
    %c0_8 = arith.constant 0 : index
    %24 = vector.load %arg4[%c0_7, %c0_8] : memref<128x256xbf16, #tpu.memory_space<vmem>>, vector<128x256xbf16>
    %cst_9 = arith.constant dense<0.000000e+00> : vector<256x256xf32>
    %25 = tpu.matmul %23, %24, %cst_9 {dimension_numbers = #tpu.dot_dimension_numbers<[1], [0], [0], [1], [0, 0, 1, 1], [], []>} : vector<256x128xbf16>, vector<128x256xbf16>, vector<256x256xf32> -> vector<256x256xf32>
    %c0_10 = arith.constant 0 : index
    %c0_11 = arith.constant 0 : index
    %26 = vector.load %arg5[%c0_10, %c0_11] : memref<1x256xf32, #tpu.memory_space<vmem>>, vector<1x256xf32>
    %27 = vector.broadcast %26 : vector<1x256xf32> to vector<256x256xf32>
    %28 = arith.addf %25, %27 : vector<256x256xf32>
    %cst_12 = arith.constant 0.000000e+00 : f32
    %29 = vector.broadcast %cst_12 : f32 to vector<256x256xf32>
    %30 = arith.maximumf %28, %29 : vector<256x256xf32>
    %31 = arith.truncf %30 : vector<256x256xf32> to vector<256x256xbf16>
    %c0_13 = arith.constant 0 : index
    %c0_14 = arith.constant 0 : index
    %32 = vector.load %arg6[%c0_13, %c0_14] : memref<256x64xbf16, #tpu.memory_space<vmem>>, vector<256x64xbf16>
    %cst_15 = arith.constant dense<0.000000e+00> : vector<256x64xf32>
    %33 = tpu.matmul %31, %32, %cst_15 {dimension_numbers = #tpu.dot_dimension_numbers<[1], [0], [0], [1], [0, 0, 1, 1], [], []>} : vector<256x256xbf16>, vector<256x64xbf16>, vector<256x64xf32> -> vector<256x64xf32>
    %c0_16 = arith.constant 0 : index
    %c0_17 = arith.constant 0 : index
    %34 = vector.load %arg7[%c0_16, %c0_17] : memref<1x64xf32, #tpu.memory_space<vmem>>, vector<1x64xf32>
    %35 = vector.broadcast %34 : vector<1x64xf32> to vector<256x64xf32>
    %36 = arith.addf %33, %35 : vector<256x64xf32>
    %c0_18 = arith.constant 0 : index
    %c0_19 = arith.constant 0 : index
    %37 = vector.load %arg8[%c0_18, %c0_19] : memref<256x64xf32, #tpu.memory_space<vmem>>, vector<256x64xf32>
    tpu.vector_store %arg8[%c0_18, %c0_19], %36 {strides = array<i32>} : memref<256x64xf32, #tpu.memory_space<vmem>>, vector<256x64xf32>,
    return
  }
  func.func @transform_0(%arg0: i32) -> (i32, i32) {
    %c0_i32 = arith.constant 0 : i32
    %c0_i32_0 = arith.constant 0 : i32
    return %arg0, %c0_i32 : i32, i32
  }
  func.func @transform_1(%arg0: i32) -> (i32, i32) {
    %c0_i32 = arith.constant 0 : i32
    %c0_i32_0 = arith.constant 0 : i32
    %c0_i32_1 = arith.constant 0 : i32
    return %c0_i32, %c0_i32_0 : i32, i32
  }
  func.func @transform_2(%arg0: i32) -> (i32, i32) {
    %c0_i32 = arith.constant 0 : i32
    %c0_i32_0 = arith.constant 0 : i32
    %c0_i32_1 = arith.constant 0 : i32
    return %c0_i32, %c0_i32_0 : i32, i32
  }
  func.func @transform_3(%arg0: i32) -> (i32, i32) {
    %c0_i32 = arith.constant 0 : i32
    %c0_i32_0 = arith.constant 0 : i32
    %c0_i32_1 = arith.constant 0 : i32
    return %c0_i32, %c0_i32_0 : i32, i32
  }
  func.func @transform_4(%arg0: i32) -> (i32, i32) {
    %c0_i32 = arith.constant 0 : i32
    %c0_i32_0 = arith.constant 0 : i32
    %c0_i32_1 = arith.constant 0 : i32
    return %c0_i32, %c0_i32_0 : i32, i32
  }
  func.func @transform_5(%arg0: i32) -> (i32, i32) {
    %c0_i32 = arith.constant 0 : i32
    %c0_i32_0 = arith.constant 0 : i32
    %c0_i32_1 = arith.constant 0 : i32
    return %c0_i32, %c0_i32_0 : i32, i32
  }
  func.func @transform_6(%arg0: i32) -> (i32, i32) {
    %c0_i32 = arith.constant 0 : i32
    %c0_i32_0 = arith.constant 0 : i32
    %c0_i32_1 = arith.constant 0 : i32
    return %c0_i32, %c0_i32_0 : i32, i32
  }
  func.func @transform_7(%arg0: i32) -> (i32, i32) {
    %c0_i32 = arith.constant 0 : i32
    %c0_i32_0 = arith.constant 0 : i32
    return %arg0, %c0_i32 : i32, i32
  }
}

</mosaic_0001>

<bundles_post_ra>
// kernel: tpu_custom_call.1
= control target key start
LH: loop header
LB: loop body
LE: loop exit
PB: predicated region body
PF: predicated region fallthrough
CT: control target
= control target key end

     0   :  { %s2078_s24 = smov 0   ;;  %s2798_s0 = inlined_call_operand.vmem [shape: f32[1024,3], index: 0, kind: input, shape index: {}]   ;;  %s2799_s1 = inlined_call_operand.vmem [shape: f32[3,128], index: 1, kind: input, shape index: {}]   ;;  %s2800_s2 = inlined_call_operand.vmem [shape: f32[1,128], index: 2, kind: input, shape index: {}]   ;;  %s2801_s3 = inlined_call_operand.vmem [shape: bf16[128,256], index: 3, kind: input, shape index: {}]   ;;  %s2802_s4 = inlined_call_operand.vmem [shape: f32[1,256], index: 4, kind: input, shape index: {}]   ;;  %s2803_s5 = inlined_call_operand.vmem [shape: bf16[256,64], index: 5, kind: input, shape index: {}]   ;;  %s2804_s6 = inlined_call_operand.vmem [shape: f32[1,64], index: 6, kind: input, shape index: {}]   ;;  %s2805_s7 = inlined_call_operand.vmem [shape: f32[1024,64], index: 7, kind: output, shape index: {}]  }
   0x1 LB: > { %s1755_s25 = sadd.s32 4294967295, %s2033_s24   ;;  %p1759_p0 = scmp.ge.s32.totalorder %s2033_s24, 1  ;;  %s2033_s24 = sphi %s2078_s24, %s17_s24  }
   0x2   : > { %p238_p1 = scmp.lt.s32.totalorder %s2033_s24, 5 }
   0x4   : > { %p239_p2 = pnand %p1759_p0, %p238_p1 }
   0x5   : > { %s1760_s26 = sshll.u32 (!%p239_p2), %s1755_s25, 5 }
   0x6   : > { %242 = sbr.rel (%p239_p2) target bundleno = 739 (0x2e3), region = 48  ;;  %p271_p3 = scmp.lt.s32.totalorder (!%p239_p2), %s1760_s26, 127 }
   0xb   : > { %v2035_v0 = vmov 1   ;;  %v2036_v1 = vmov 0   ;;  %v2037_v2 = vmov 2   ;;  %s2807_s26 = smov (!%p271_p3, %s1760_s26), 127  ;;  %v1822_v13 = vld [vmem:[%s2801_s3 + $0x70] sm:$0xf] }
   0xc   : > { %1938 = vset.pattern.permute.xlu1 %v2035_v0  ;;  %1937 = vset.pattern.permute.xlu0 %v2036_v1  ;;  %s1761_s27 = sshll.u32 %s2807_s26, 3  ;;  %v1909_v14 = vld [vmem:[%s2801_s3 + $0x74] sm:$0xf0]  ;;  %v1908_v15 = vld [vmem:[%s2801_s3 + $0x74] sm:$0xf]  ;;  %vm1666_vm0 = vcmask 523264  }
   0xd   : > { %1939 = vset.pattern.permute.xlu2 %v2037_v2  ;;  %s2097_s30 = scalar_lea.vmem %s2798_s0, %s1761_s27  ;;  %v1823_v16 = vor.u32 %v1909_v14, %v1822_v13  ;;  %v1824_v17 = vld [vmem:[%s2801_s3 + $0x78] sm:$0xf0]  ;;  %v1814_v21 = vld [vmem:[%s2801_s3 + $0x60] sm:$0xf]  ;;  %v1907_v22 = vld [vmem:[%s2801_s3 + $0x64] sm:$0xf0]  ;;  %s2653_s11 = scalar_lea.vmem %s2805_s7, %s1761_s27 }
   0xe   : > { %v282_v3 = vld [vmem:[%s2097_s30] sm:$0xff]  ;;  %v283_v4 = vld [vmem:[%s2097_s30 + $0x8] sm:$0xff]  ;;  %v284_v5 = vld [vmem:[%s2097_s30 + $0x10] sm:$0xff]  ;;  %v1827_v18 = vor.u32 %v1908_v15, %v1824_v17  ;;  %v1815_v24 = vor.u32 %v1907_v22, %v1814_v21 }
   0xf   : > { %510 = vperm.xlu1 %1938, %v282_v3   ;;  %317 = vperm.xlu0 %1937, %v282_v3   ;;  %v285_v6 = vld [vmem:[%s2097_s30 + $0x18] sm:$0xff]  ;;  %v286_v7 = vld [vmem:[%s2097_s30 + $0x20] sm:$0xff]  ;;  %v287_v8 = vld [vmem:[%s2097_s30 + $0x28] sm:$0xff] }
  0x10   : > { %704 = vperm.xlu2 %1939, %v282_v3   ;;  %v288_v9 = vld [vmem:[%s2097_s30 + $0x30] sm:$0xff]  ;;  %v289_v10 = vld [vmem:[%s2097_s30 + $0x38] sm:$0xff]  ;;  %v2120_v11 = vld [vmem:[%s2097_s30 + $0x48] sm:$0xff]  ;;  %1082 = vmatpush.bf16.msra.mxu0 %v1823_v16 }
  0x11   : > { %v2127_v12 = vld [vmem:[%s2097_s30 + $0x50] sm:$0xff]  ;;  %1171 = vmatpush.bf16.msra.mxu1 %v1827_v18  ;;  %v290_v19 = vld [vmem:[%s2097_s30 + $0x40] sm:$0xff]  ;;  %v2146_v20 = vld [vmem:[%s2097_s30 + $0x58] sm:$0xff] }
  0x12   : > { %v1906_v23 = vld [vmem:[%s2801_s3 + $0x64] sm:$0xf]  ;;  %v1816_v25 = vld [vmem:[%s2801_s3 + $0x68] sm:$0xf0]  ;;  %v1806_v27 = vld [vmem:[%s2801_s3 + $0x50] sm:$0xf] }
  0x13   : > { %v1819_v26 = vor.u32 %v1906_v23, %v1816_v25  ;;  %v1905_v28 = vld [vmem:[%s2801_s3 + $0x54] sm:$0xf0]  ;;  %v1904_v29 = vld [vmem:[%s2801_s3 + $0x54] sm:$0xf]  ;;  %v1808_v30 = vld [vmem:[%s2801_s3 + $0x58] sm:$0xf0] }
  0x14   : > { %1083 = vmatpush.bf16.msra.mxu0 %v1815_v24  ;;  %v1807_v31 = vor.u32 %v1905_v28, %v1806_v27  ;;  %v1811_v32 = vor.u32 %v1904_v29, %v1808_v30  ;;  %v1798_v33 = vld [vmem:[%s2801_s3 + $0x40] sm:$0xf]  ;;  %v1903_v34 = vld [vmem:[%s2801_s3 + $0x44] sm:$0xf0]  ;;  %v1902_v36 = vld [vmem:[%s2801_s3 + $0x44] sm:$0xf] }
  0x15   : > { %1172 = vmatpush.bf16.msra.mxu1 %v1819_v26  ;;  %v1799_v35 = vor.u32 %v1903_v34, %v1798_v33  ;;  %v1800_v37 = vld [vmem:[%s2801_s3 + $0x48] sm:$0xf0]  ;;  %v2190_v39 = vld [vmem:[%s2097_s30 + $0x60] sm:$0xff]  ;;  %v1790_v40 = vld [vmem:[%s2801_s3 + $0x30] sm:$0xf] }
  0x16   : > { %v1803_v38 = vor.u32 %v1902_v36, %v1800_v37  ;;  %v1901_v41 = vld [vmem:[%s2801_s3 + $0x34] sm:$0xf0]  ;;  %v1900_v42 = vld [vmem:[%s2801_s3 + $0x34] sm:$0xf]  ;;  %v1792_v44 = vld [vmem:[%s2801_s3 + $0x38] sm:$0xf0] }
  0x17   : > { %514 = vperm.xlu1 %1938, %v283_v4   ;;  %322 = vperm.xlu0 %1937, %v283_v4   ;;  %v1791_v43 = vor.u32 %v1901_v41, %v1790_v40  ;;  %v1795_v45 = vor.u32 %v1900_v42, %v1792_v44  ;;  %v1782_v46 = vld [vmem:[%s2801_s3 + $0x20] sm:$0xf]  ;;  %v1899_v47 = vld [vmem:[%s2801_s3 + $0x24] sm:$0xf0]  ;;  %v1898_v48 = vld [vmem:[%s2801_s3 + $0x24] sm:$0xf] }
  0x18   : > { %708 = vperm.xlu2 %1939, %v283_v4   ;;  %1084 = vmatpush.bf16.msra.mxu0 %v1807_v31  ;;  %v1783_v49 = vor.u32 %v1899_v47, %v1782_v46  ;;  %v1784_v50 = vld [vmem:[%s2801_s3 + $0x28] sm:$0xf0]  ;;  %v1774_v54 = vld [vmem:[%s2801_s3 + $0x10] sm:$0xf]  ;;  %v1897_v55 = vld [vmem:[%s2801_s3 + $0x14] sm:$0xf0] }
  0x19   : > { %1173 = vmatpush.bf16.msra.mxu1 %v1811_v32  ;;  %v1787_v52 = vor.u32 %v1898_v48, %v1784_v50  ;;  %v295_v53 = vld [vmem:[%s2097_s30 + $0x68] sm:$0xff]  ;;  %v1896_v56 = vld [vmem:[%s2801_s3 + $0x14] sm:$0xf]  ;;  %v1776_v57 = vld [vmem:[%s2801_s3 + $0x18] sm:$0xf0]  ;;  %v1775_v58 = vor.u32 %v1897_v55, %v1774_v54 }
  0x1a   : > { %v1779_v59 = vor.u32 %v1896_v56, %v1776_v57  ;;  %v1766_v60 = vld [vmem:[%s2801_s3] sm:$0xf]  ;;  %v1895_v61 = vld [vmem:[%s2801_s3 + $0x4] sm:$0xf0]  ;;  %v1894_v62 = vld [vmem:[%s2801_s3 + $0x4] sm:$0xf] }
  0x1b   : > { %v1768_v63 = vld [vmem:[%s2801_s3 + $0x8] sm:$0xf0]  ;;  %v1767_v4 = vor.u32 %v1895_v61, %v1766_v60  ;;  %v2285_v23 = vld [vmem:[%s2800_s2] ss:$0 sm:$0xff]  ;;  %v297_v36 = vld [vmem:[%s2097_s30 + $0x78] sm:$0xff] }
  0x1c   : > { %1085 = vmatpush.bf16.msra.mxu0 %v1799_v35  ;;  %v2294_v31 = vld [vmem:[%s2097_s30 + $0x88] sm:$0xff]  ;;  %v2304_v40 = vld [vmem:[%s2097_s30 + $0x90] sm:$0xff]  ;;  %v2320_v55 = vld [vmem:[%s2097_s30 + $0x98] sm:$0xff] }
  0x1d   : > { %1174 = vmatpush.bf16.msra.mxu1 %v1803_v38 }
  0x1f   : > { %1940 = vset.pattern.permute.xlu1 %v2036_v1  ;;  %327 = vperm.xlu0 %1937, %v284_v5  }
  0x20   : > { %332 = vperm.xlu1 %1940, %v285_v6   ;;  %1941 = vset.pattern.permute.xlu2 %v2035_v0 }
  0x21   : > { %518 = vperm.xlu2 %1941, %v284_v5   ;;  %1086 = vmatpush.bf16.msra.mxu0 %v1791_v43 }
  0x22   : > { %1175 = vmatpush.bf16.msra.mxu1 %v1795_v45 }
  0x25   : > { %1087 = vmatpush.bf16.msra.mxu0 %v1783_v49 }
  0x26   : > { %1176 = vmatpush.bf16.msra.mxu1 %v1787_v52 }
  0x27   : > { %1942 = vset.pattern.permute.xlu0 %v2035_v0 }
  0x28   : > { %1943 = vset.pattern.permute.xlu1 %v2037_v2  ;;  %522 = vperm.xlu0 %1942, %v285_v6  }
  0x29   : > { %712 = vperm.xlu1 %1943, %v284_v5   ;;  %1944 = vset.pattern.permute.xlu2 %v2037_v2  ;;  %v1771_v5 = vor.u32 %v1894_v62, %v1768_v63  ;;  %v298_v62 = vld [vmem:[%s2097_s30 + $0x80] sm:$0xff] }
  0x2a   : > { %716 = vperm.xlu2 %1944, %v285_v6   ;;  %1088 = vmatpush.bf16.msra.mxu0 %v1775_v58  ;;  %v2251_v6 = vld [vmem:[%s2097_s30 + $0x70] sm:$0xff] }
  0x2b   : > { %1177 = vmatpush.bf16.msra.mxu1 %v1779_v59 }
  0x2e   : > { %1089 = vmatpush.bf16.msra.mxu0 %v1767_v4 }
  0x2f   : > { %1178 = vmatpush.bf16.msra.mxu1 %v1771_v5 }
  0x30   : > { %526 = vperm.xlu0 %1942, %v286_v7  }
  0x31   : > { %1945 = vset.pattern.permute.xlu1 %v2036_v1 }
  0x32   : > { %337 = vperm.xlu1 %1945, %v286_v7   ;;  %1946 = vset.pattern.permute.xlu2 %v2036_v1 }
  0x33   : > { %342 = vperm.xlu2 %1946, %v287_v8  }
  0x38   : > { %1949 = vset.pattern.permute.xlu0 %v2037_v2 }
  0x39   : > { %724 = vperm.xlu0 %1949, %v287_v8  }
  0x3a   : > { %1947 = vset.pattern.permute.xlu1 %v2035_v0 }
  0x3b   : > { %530 = vperm.xlu1 %1947, %v287_v8   ;;  %1948 = vset.pattern.permute.xlu2 %v2037_v2  ;;  %v2262_v8 = vld [vmem:[%s2799_s1 + $0x1] ss:$0 sm:$0xff] }
  0x3c   : > { %720 = vperm.xlu2 %1948, %v286_v7  }
  0x41   : > { %728 = vperm.xlu0 %1949, %v288_v9  }
  0x43   : > { %1950 = vset.pattern.permute.xlu1 %v2036_v1 }
  0x44   : > { %347 = vperm.xlu1 %1950, %v288_v9   ;;  %1951 = vset.pattern.permute.xlu2 %v2036_v1 }
  0x45   : > { %352 = vperm.xlu2 %1951, %v289_v10  }
  0x49   : > { %1956 = vset.pattern.permute.xlu0 %v2036_v1 }
  0x4a   : > { %362 = vperm.xlu0 %1956, %v2120_v11  }
  0x4c   : > { %1952 = vset.pattern.permute.xlu1 %v2035_v0 }
  0x4d   : > { %534 = vperm.xlu1 %1952, %v288_v9   ;;  %1953 = vset.pattern.permute.xlu2 %v2035_v0  ;;  %v2267_v9 = vld [vmem:[%s2799_s1] ss:$0 sm:$0xff] }
  0x4e   : > { %538 = vperm.xlu2 %1953, %v289_v10  }
  0x52   : > { %367 = vperm.xlu0 %1956, %v2127_v12  }
  0x55   : > { %1954 = vset.pattern.permute.xlu1 %v2037_v2 }
  0x56   : > { %732 = vperm.xlu1 %1954, %v289_v10   ;;  %1955 = vset.pattern.permute.xlu2 %v2036_v1 }
  0x57   : > { %357 = vperm.xlu2 %1955, %v290_v19  }
  0x5a   : > { %1963 = vset.pattern.permute.xlu0 %v2035_v0 }
  0x5b   : > { %554 = vperm.xlu0 %1963, %v2146_v20  }
  0x5e   : > { %1957 = vset.pattern.permute.xlu1 %v2035_v0 }
  0x5f   : > { %542 = vperm.xlu1 %1957, %v290_v19   ;;  %1958 = vset.pattern.permute.xlu2 %v2035_v0 }
  0x60   : > { %546 = vperm.xlu2 %1958, %v2120_v11  }
  0x63   : > { %558 = vperm.xlu0 %1963, %v2190_v39  }
  0x67   : > { %1959 = vset.pattern.permute.xlu1 %v2037_v2 }
  0x68   : > { %736 = vperm.xlu1 %1959, %v290_v19   ;;  %1960 = vset.pattern.permute.xlu2 %v2037_v2 }
  0x69   : > { %740 = vperm.xlu2 %1960, %v2120_v11  }
  0x6a   : > { %v705_v51 = vpop.permute.xlu2 %704 }
  0x6b   : > { %1970 = vset.pattern.permute.xlu0 %v2037_v2 }
  0x6c   : > { %756 = vperm.xlu0 %1970, %v295_v53  }
  0x70   : > { %1961 = vset.pattern.permute.xlu1 %v2036_v1 }
  0x71   : > { %372 = vperm.xlu1 %1961, %v2146_v20   ;;  %1962 = vset.pattern.permute.xlu2 %v2035_v0 }
  0x72   : > { %550 = vperm.xlu2 %1962, %v2127_v12   ;;  %v709_v3 = vpop.permute.xlu2 %708 }
  0x74   : > { %760 = vperm.xlu0 %1970, %v2251_v6  }
  0x79   : > { %1964 = vset.pattern.permute.xlu1 %v2037_v2 }
  0x7a   : > { %744 = vperm.xlu1 %1964, %v2127_v12   ;;  %1965 = vset.pattern.permute.xlu2 %v2037_v2  ;;  %v2272_v12 = vld [vmem:[%s2799_s1 + $0x2] ss:$0 sm:$0xff] }
  0x7b   : > { %748 = vperm.xlu2 %1965, %v2146_v20   ;;  %v519_v7 = vpop.permute.xlu2 %518  ;;  %v832_v16 = vmul.f32 %v2272_v12, %v705_v51  ;;  %v833_v24 = vmul.f32 %v2272_v12, %v709_v3 }
  0x7c   : > { %1977 = vset.pattern.permute.xlu0 %v2036_v1  ;;  %v640_v37 = vmul.f32 %v2262_v8, %v519_v7 }
  0x7d   : > { %402 = vperm.xlu0 %1977, %v2294_v31  }
  0x81   : > { %v511_v10 = vpop.permute.xlu1 %510  ;;  %v318_v11 = vpop.permute.xlu0 %317 }
  0x82   : > { %v638_v13 = vmul.f32 %v2262_v8, %v511_v10  ;;  %v476_v14 = vmul.f32 %v2267_v9, %v318_v11  ;;  %1966 = vset.pattern.permute.xlu1 %v2036_v1 }
  0x83   : > { %377 = vperm.xlu1 %1966, %v2190_v39   ;;  %1967 = vset.pattern.permute.xlu2 %v2036_v1 }
  0x84   : > { %382 = vperm.xlu2 %1967, %v295_v53   ;;  %v717_v15 = vpop.permute.xlu2 %716  ;;  %v670_v17 = vadd.f32 %v638_v13, %v476_v14 }
  0x85   : > { %407 = vperm.xlu0 %1977, %v2304_v40   ;;  %v835_v44 = vmul.f32 %v2272_v12, %v717_v15 }
  0x86   : > { %v864_v20 = vadd.f32 %v832_v16, %v670_v17 }
  0x88   : > { %v900_v28 = vadd.f32 %v2285_v23, %v864_v20 }
  0x89   : > { %v515_v18 = vpop.permute.xlu1 %514  ;;  %v323_v19 = vpop.permute.xlu0 %322 }
  0x8a   : > { %v639_v21 = vmul.f32 %v2262_v8, %v515_v18  ;;  %v477_v22 = vmul.f32 %v2267_v9, %v323_v19  ;;  %v932_v33 = vmax.f32 %v900_v28, 0.0  ;;  %v2340_v19 = vld [vmem:[%s2097_s30 + $0xa0] sm:$0xff] }
  0x8b   : > { %1968 = vset.pattern.permute.xlu1 %v2035_v0 }
  0x8c   : > { %v671_v25 = vadd.f32 %v639_v21, %v477_v22  ;;  %562 = vperm.xlu1 %1968, %v295_v53   ;;  %1969 = vset.pattern.permute.xlu2 %v2037_v2 }
  0x8d   : > { %752 = vperm.xlu2 %1969, %v2190_v39   ;;  %v343_v26 = vpop.permute.xlu2 %342  ;;  %1984 = vset.pattern.permute.xlu0 %v2035_v0 }
  0x8e   : > { %v865_v27 = vadd.f32 %v833_v24, %v671_v25  ;;  %586 = vperm.xlu0 %1984, %v2320_v55   ;;  %v481_v7 = vmul.f32 %v2267_v9, %v343_v26  ;;  %v303_v26 = vld [vmem:[%s2097_s30 + $0xa8] sm:$0xff] }
  0x90   : > { %v901_v29 = vadd.f32 %v2285_v23, %v865_v27 }
  0x91   : > { %v328_v30 = vpop.permute.xlu0 %327 }
  0x92   : > { %v333_v32 = vpop.permute.xlu1 %332  ;;  %v933_v34 = vmax.f32 %v901_v29, 0.0  ;;  %v478_v38 = vmul.f32 %v2267_v9, %v328_v30 }
  0x93   : > { %v479_v43 = vmul.f32 %v2267_v9, %v333_v32 }
  0x94   : > { %1971 = vset.pattern.permute.xlu1 %v2036_v1  ;;  %v964_v35 = vpack.c.bf16 %v933_v34, %v932_v33  ;;  %v672_v41 = vadd.f32 %v640_v37, %v478_v38 }
  0x95   : > { %387 = vperm.xlu1 %1971, %v2251_v6   ;;  %1972 = vset.pattern.permute.xlu2 %v2036_v1 }
  0x96   : > { %1090 = vmatmul.bf16.vlgmr.msra.gmra.mxu0 %v964_v35  ;;  %1179 = vmatmul.bf16.vlgmr.msra.gmra.mxu1 %v964_v35  ;;  %v721_v39 = vpop.permute.xlu2 %720 }
  0x97   : > { %392 = vperm.xlu2 %1972, %v297_v36   ;;  %v836_v4 = vmul.f32 %v2272_v12, %v721_v39  ;;  %590 = vperm.xlu0 %1984, %v2340_v19  }
  0x9a   : > { %v523_v42 = vpop.permute.xlu0 %522 }
  0x9b   : > { %v641_v45 = vmul.f32 %v2262_v8, %v523_v42  ;;  %v713_v46 = vpop.permute.xlu1 %712 }
  0x9c   : > { %v834_v47 = vmul.f32 %v2272_v12, %v713_v46 }
  0x9d   : > { %v673_v48 = vadd.f32 %v641_v45, %v479_v43  ;;  %1973 = vset.pattern.permute.xlu1 %v2035_v0 }
  0x9e   : > { %v866_v49 = vadd.f32 %v834_v47, %v672_v41  ;;  %566 = vperm.xlu1 %1973, %v2251_v6  }
  0x9f   : > { %v867_v50 = vadd.f32 %v835_v44, %v673_v48  ;;  %1974 = vset.pattern.permute.xlu2 %v2035_v0  ;;  %v2314_v51 = vpop.permute.xlu2 %352  ;;  %1991 = vset.pattern.permute.xlu0 %v2037_v2 }
  0xa0   : > { %v902_v52 = vadd.f32 %v2285_v23, %v866_v49  ;;  %570 = vperm.xlu2 %1974, %v297_v36   ;;  %788 = vperm.xlu0 %1991, %v303_v26   ;;  %v483_v34 = vmul.f32 %v2267_v9, %v2314_v51 }
  0xa1   : > { %v903_v53 = vadd.f32 %v2285_v23, %v867_v50 }
  0xa2   : > { %v934_v54 = vmax.f32 %v902_v52, 0.0  ;;  %v527_v56 = vpop.permute.xlu0 %526 }
  0xa3   : > { %v935_v57 = vmax.f32 %v903_v53, 0.0  ;;  %v642_v61 = vmul.f32 %v2262_v8, %v527_v56 }
  0xa4   : > { %v338_v58 = vpop.permute.xlu1 %337 }
  0xa5   : > { %v965_v59 = vpack.c.bf16 %v935_v57, %v934_v54  ;;  %v480_v60 = vmul.f32 %v2267_v9, %v338_v58 }
  0xa6   : > { %1975 = vset.pattern.permute.xlu1 %v2037_v2 }
  0xa7   : > { %764 = vperm.xlu1 %1975, %v297_v36   ;;  %1095 = vmatmul.bf16.gmra.mxu0 %v965_v59  ;;  %v674_v3 = vadd.f32 %v642_v61, %v480_v60  ;;  %v2359_v36 = vld [vmem:[%s2097_s30 + $0xb0] sm:$0xff] }
  0xa8   : > { %1184 = vmatmul.bf16.gmra.mxu1 %v965_v59  ;;  %1976 = vset.pattern.permute.xlu2 %v2036_v1  ;;  %v539_v63 = vpop.permute.xlu2 %538 }
  0xa9   : > { %397 = vperm.xlu2 %1976, %v298_v62   ;;  %v868_v10 = vadd.f32 %v836_v4, %v674_v3  ;;  %v645_v35 = vmul.f32 %v2262_v8, %v539_v63  ;;  %792 = vperm.xlu0 %1991, %v2359_v36  }
  0xab   : > { %v725_v5 = vpop.permute.xlu0 %724  ;;  %v904_v17 = vadd.f32 %v2285_v23, %v868_v10  ;;  %v677_v39 = vadd.f32 %v645_v35, %v483_v34  ;;  %v2388_v10 = vld [vmem:[%s2097_s30 + $0xc8] sm:$0xff]  ;;  %v1922_v35 = vld [vmem:[%s2803_s5 + $0x60] sm:$0xff] }
  0xac   : > { %v837_v13 = vmul.f32 %v2272_v12, %v725_v5 }
  0xad   : > { %v531_v6 = vpop.permute.xlu1 %530  ;;  %v936_v21 = vmax.f32 %v904_v17, 0.0 }
  0xae   : > { %v643_v11 = vmul.f32 %v2262_v8, %v531_v6 }
  0xaf   : > { %1978 = vset.pattern.permute.xlu1 %v2035_v0 }
  0xb0   : > { %v675_v14 = vadd.f32 %v643_v11, %v481_v7  ;;  %574 = vperm.xlu1 %1978, %v298_v62   ;;  %v1917_v11 = vld [vmem:[%s2803_s5 + $0x38] sm:$0xff] }
  0xb1   : > { %1979 = vset.pattern.permute.xlu2 %v2035_v0  ;;  %v2334_v15 = vpop.permute.xlu2 %357  ;;  %1998 = vset.pattern.permute.xlu0 %v2036_v1 }
  0xb2   : > { %v869_v16 = vadd.f32 %v837_v13, %v675_v14  ;;  %578 = vperm.xlu2 %1979, %v2294_v31   ;;  %v484_v58 = vmul.f32 %v2267_v9, %v2334_v15  ;;  %v1925_v13 = vld [vmem:[%s2803_s5 + $0x78] sm:$0xff]  ;;  %442 = vperm.xlu0 %1998, %v2388_v10  }
  0xb3   : > { %v729_v29 = vpop.permute.xlu0 %728  ;;  %1488 = vmatpush.bf16.msra.mxu2 %v1917_v11  ;;  %1577 = vmatpush.bf16.msra.mxu3 %v1925_v13  ;;  %v2481_v13 = vld [vmem:[%s2097_s30 + $0xe0] sm:$0xff] }
  0xb4   : > { %v905_v18 = vadd.f32 %v2285_v23, %v869_v16  ;;  %v838_v33 = vmul.f32 %v2272_v12, %v729_v29  ;;  %v1923_v29 = vld [vmem:[%s2803_s5 + $0x68] sm:$0xff] }
  0xb6   : > { %v348_v20 = vpop.permute.xlu1 %347  ;;  %v937_v22 = vmax.f32 %v905_v18, 0.0  ;;  %v1916_v18 = vld [vmem:[%s2803_s5 + $0x30] sm:$0xff] }
  0xb7   : > { %v482_v30 = vmul.f32 %v2267_v9, %v348_v20  ;;  %v305_v20 = vld [vmem:[%s2097_s30 + $0xb8] sm:$0xff]  ;;  %1489 = vmatpush.bf16.msra.mxu2 %v1916_v18 }
  0xb8   : > { %1980 = vset.pattern.permute.xlu1 %v2037_v2  ;;  %v966_v24 = vpack.c.bf16 %v937_v22, %v936_v21 }
  0xb9   : > { %768 = vperm.xlu1 %1980, %v298_v62  }
  0xba   : > { %1100 = vmatmul.bf16.gmra.mxu0 %v966_v24  ;;  %1189 = vmatmul.bf16.gmra.mxu1 %v966_v24  ;;  %v547_v25 = vpop.permute.xlu2 %546 }
  0xbb   : > { %1981 = vset.pattern.permute.xlu2 %v2037_v2  ;;  %v647_v47 = vmul.f32 %v2262_v8, %v547_v25 }
  0xbc   : > { %772 = vperm.xlu2 %1981, %v2294_v31   ;;  %v363_v44 = vpop.permute.xlu0 %362 }
  0xbd   : > { %v485_v50 = vmul.f32 %v2267_v9, %v363_v44 }
  0xbf   : > { %v535_v27 = vpop.permute.xlu1 %534  ;;  %v679_v52 = vadd.f32 %v647_v47, %v485_v50  ;;  %v1920_v50 = vld [vmem:[%s2803_s5 + $0x50] sm:$0xff] }
  0xc0   : > { %v644_v28 = vmul.f32 %v2262_v8, %v535_v27  ;;  %v2413_v27 = vld [vmem:[%s2097_s30 + $0xd0] sm:$0xff] }
  0xc1   : > { %1982 = vset.pattern.permute.xlu1 %v2036_v1  ;;  %447 = vperm.xlu0 %1998, %v2413_v27  }
  0xc2   : > { %412 = vperm.xlu1 %1982, %v2320_v55   ;;  %v676_v32 = vadd.f32 %v644_v28, %v482_v30  ;;  %v1915_v28 = vld [vmem:[%s2803_s5 + $0x28] sm:$0xff] }
  0xc3   : > { %v741_v31 = vpop.permute.xlu2 %740  ;;  %1490 = vmatpush.bf16.msra.mxu2 %v1915_v28 }
  0xc4   : > { %1983 = vset.pattern.permute.xlu2 %v2035_v0  ;;  %v870_v37 = vadd.f32 %v838_v33, %v676_v32  ;;  %v841_v53 = vmul.f32 %v2272_v12, %v741_v31  ;;  %v368_v54 = vpop.permute.xlu0 %367  ;;  %v1914_v31 = vld [vmem:[%s2803_s5 + $0x20] sm:$0xff] }
  0xc5   : > { %582 = vperm.xlu2 %1983, %v2304_v40   ;;  %v486_v21 = vmul.f32 %v2267_v9, %v368_v54  ;;  %v1919_v54 = vld [vmem:[%s2803_s5 + $0x48] sm:$0xff] }
  0xc6   : > { %v906_v43 = vadd.f32 %v2285_v23, %v870_v37  ;;  %v873_v56 = vadd.f32 %v841_v53, %v679_v52  ;;  %v306_v52 = vld [vmem:[%s2097_s30 + $0xc0] sm:$0xff]  ;;  %v1911_v53 = vld [vmem:[%s2803_s5 + $0x8] sm:$0xff] }
  0xc7   : > { %1491 = vmatpush.bf16.msra.mxu2 %v1914_v31 }
  0xc8   : > { %v733_v38 = vpop.permute.xlu1 %732  ;;  %v938_v48 = vmax.f32 %v906_v43, 0.0  ;;  %v909_v62 = vadd.f32 %v2285_v23, %v873_v56  ;;  %v1921_v43 = vld [vmem:[%s2803_s5 + $0x58] sm:$0xff] }
  0xc9   : > { %v839_v41 = vmul.f32 %v2272_v12, %v733_v38  ;;  %2005 = vset.pattern.permute.xlu0 %v2035_v0 }
  0xca   : > { %1985 = vset.pattern.permute.xlu1 %v2037_v2  ;;  %v941_v4 = vmax.f32 %v909_v62, 0.0 }
  0xcb   : > { %v871_v42 = vadd.f32 %v839_v41, %v677_v39  ;;  %776 = vperm.xlu1 %1985, %v2304_v40  }
  0xcc   : > { %v551_v46 = vpop.permute.xlu2 %550 }
  0xcd   : > { %v907_v45 = vadd.f32 %v2285_v23, %v871_v42  ;;  %1986 = vset.pattern.permute.xlu2 %v2037_v2  ;;  %v555_v5 = vpop.permute.xlu0 %554  ;;  %v648_v22 = vmul.f32 %v2262_v8, %v551_v46  ;;  %v1913_v42 = vld [vmem:[%s2803_s5 + $0x18] sm:$0xff] }
  0xce   : > { %780 = vperm.xlu2 %1986, %v2320_v55   ;;  %v649_v15 = vmul.f32 %v2262_v8, %v555_v5  ;;  %1492 = vmatpush.bf16.msra.mxu2 %v1913_v42 }
  0xcf   : > { %v939_v49 = vmax.f32 %v907_v45, 0.0  ;;  %v680_v30 = vadd.f32 %v648_v22, %v486_v21  ;;  %v2444_v45 = vld [vmem:[%s2097_s30 + $0xd8] sm:$0xff] }
  0xd0   : > { %618 = vperm.xlu0 %2005, %v2444_v45  }
  0xd1   : > { %v543_v51 = vpop.permute.xlu1 %542  ;;  %v967_v40 = vpack.c.bf16 %v939_v49, %v938_v48  ;;  %v1912_v49 = vld [vmem:[%s2803_s5 + $0x10] sm:$0xff] }
  0xd2   : > { %v646_v55 = vmul.f32 %v2262_v8, %v543_v51  ;;  %1493 = vmatpush.bf16.msra.mxu2 %v1912_v49 }
  0xd3   : > { %1987 = vset.pattern.permute.xlu1 %v2036_v1  ;;  %1105 = vmatmul.bf16.gmra.mxu0 %v967_v40 }
  0xd4   : > { %1194 = vmatmul.bf16.gmra.mxu1 %v967_v40  ;;  %417 = vperm.xlu1 %1987, %v2340_v19   ;;  %v678_v60 = vadd.f32 %v646_v55, %v484_v58 }
  0xd5   : > { %v749_v57 = vpop.permute.xlu2 %748  ;;  %v559_v46 = vpop.permute.xlu0 %558 }
  0xd6   : > { %1988 = vset.pattern.permute.xlu2 %v2036_v1  ;;  %v843_v25 = vmul.f32 %v2272_v12, %v749_v57  ;;  %v650_v40 = vmul.f32 %v2262_v8, %v559_v46  ;;  %1494 = vmatpush.bf16.msra.mxu2 %v1911_v53 }
  0xd7   : > { %422 = vperm.xlu2 %1988, %v303_v26  }
  0xd8   : > { %622 = vperm.xlu0 %2005, %v2481_v13  }
  0xda   : > { %v737_v59 = vpop.permute.xlu1 %736 }
  0xdb   : > { %v840_v61 = vmul.f32 %v2272_v12, %v737_v59 }
  0xdc   : > { %1989 = vset.pattern.permute.xlu1 %v2035_v0 }
  0xdd   : > { %v872_v63 = vadd.f32 %v840_v61, %v678_v60  ;;  %594 = vperm.xlu1 %1989, %v303_v26   ;;  %v1910_v60 = vld [vmem:[%s2803_s5] sm:$0xff] }
  0xde   : > { %v2385_v6 = vpop.permute.xlu2 %382  ;;  %v757_v57 = vpop.permute.xlu0 %756  ;;  %v1918_v61 = vld [vmem:[%s2803_s5 + $0x40] sm:$0xff]  ;;  %1495 = vmatpush.bf16.msra.mxu2 %v1910_v60 }
  0xdf   : > { %v908_v3 = vadd.f32 %v2285_v23, %v872_v63  ;;  %1990 = vset.pattern.permute.xlu2 %v2037_v2  ;;  %v489_v62 = vmul.f32 %v2267_v9, %v2385_v6 }
  0xe0   : > { %784 = vperm.xlu2 %1990, %v2340_v19   ;;  %v1924_v19 = vld [vmem:[%s2803_s5 + $0x70] sm:$0xff]  ;;  %2012 = vset.pattern.permute.xlu0 %v2037_v2 }
  0xe1   : > { %v940_v7 = vmax.f32 %v908_v3, 0.0  ;;  %1578 = vmatpush.bf16.msra.mxu3 %v1924_v19  ;;  %v2490_v19 = vld [vmem:[%s2097_s30 + $0xe8] sm:$0xff] }
  0xe2   : > { %820 = vperm.xlu0 %2012, %v2490_v19  }
  0xe3   : > { %v373_v14 = vpop.permute.xlu1 %372  ;;  %v968_v16 = vpack.c.bf16 %v941_v4, %v940_v7  ;;  %v845_v4 = vmul.f32 %v2272_v12, %v757_v57 }
  0xe4   : > { %v487_v17 = vmul.f32 %v2267_v9, %v373_v14 }
  0xe5   : > { %1992 = vset.pattern.permute.xlu1 %v2036_v1  ;;  %1110 = vmatmul.bf16.gmra.mxu0 %v968_v16 }
  0xe6   : > { %1199 = vmatmul.bf16.gmra.mxu1 %v968_v16  ;;  %427 = vperm.xlu1 %1992, %v2359_v36   ;;  %v681_v24 = vadd.f32 %v649_v15, %v487_v17 }
  0xe7   : > { %v753_v26 = vpop.permute.xlu2 %752  ;;  %1579 = vmatpush.bf16.msra.mxu3 %v1923_v29 }
  0xe8   : > { %1993 = vset.pattern.permute.xlu2 %v2036_v1  ;;  %v875_v32 = vadd.f32 %v843_v25, %v681_v24  ;;  %v844_v56 = vmul.f32 %v2272_v12, %v753_v26  ;;  %v761_v24 = vpop.permute.xlu0 %760 }
  0xe9   : > { %432 = vperm.xlu2 %1993, %v305_v20  }
  0xea   : > { %v911_v38 = vadd.f32 %v2285_v23, %v875_v32 }
  0xeb   : > { %1580 = vmatpush.bf16.msra.mxu3 %v1922_v35  ;;  %v2512_v35 = vld [vmem:[%s2097_s30 + $0xf0] sm:$0xff] }
  0xec   : > { %v745_v33 = vpop.permute.xlu1 %744  ;;  %v943_v44 = vmax.f32 %v911_v38, 0.0  ;;  %824 = vperm.xlu0 %2012, %v2512_v35  }
  0xed   : > { %v842_v34 = vmul.f32 %v2272_v12, %v745_v33 }
  0xee   : > { %1994 = vset.pattern.permute.xlu1 %v2035_v0 }
  0xef   : > { %v874_v37 = vadd.f32 %v842_v34, %v680_v30  ;;  %598 = vperm.xlu1 %1994, %v2359_v36   ;;  %1581 = vmatpush.bf16.msra.mxu3 %v1921_v43  ;;  %v846_v30 = vmul.f32 %v2272_v12, %v761_v24 }
  0xf1   : > { %v910_v39 = vadd.f32 %v2285_v23, %v874_v37  ;;  %1995 = vset.pattern.permute.xlu2 %v2035_v0  ;;  %v2434_v41 = vpop.permute.xlu2 %392 }
  0xf2   : > { %602 = vperm.xlu2 %1995, %v305_v20   ;;  %v491_v33 = vmul.f32 %v2267_v9, %v2434_v41 }
  0xf3   : > { %v942_v36 = vmax.f32 %v910_v39, 0.0  ;;  %1582 = vmatpush.bf16.msra.mxu3 %v1920_v50 }
  0xf5   : > { %v378_v47 = vpop.permute.xlu1 %377  ;;  %v969_v48 = vpack.c.bf16 %v943_v44, %v942_v36 }
  0xf6   : > { %v488_v51 = vmul.f32 %v2267_v9, %v378_v47 }
  0xf7   : > { %1996 = vset.pattern.permute.xlu1 %v2037_v2  ;;  %1115 = vmatmul.bf16.gmra.mxu0 %v969_v48 }
  0xf8   : > { %1204 = vmatmul.bf16.gmra.mxu1 %v969_v48  ;;  %796 = vperm.xlu1 %1996, %v305_v20   ;;  %v682_v55 = vadd.f32 %v650_v40, %v488_v51  ;;  %v403_v40 = vpop.permute.xlu0 %402 }
  0xf9   : > { %1583 = vmatpush.bf16.msra.mxu3 %v1919_v54  ;;  %v493_v57 = vmul.f32 %v2267_v9, %v403_v40 }
  0xfa   : > { %1997 = vset.pattern.permute.xlu2 %v2036_v1  ;;  %v571_v58 = vpop.permute.xlu2 %570  ;;  %v876_v63 = vadd.f32 %v844_v56, %v682_v55 }
  0xfb   : > { %437 = vperm.xlu2 %1997, %v306_v52   ;;  %v653_v31 = vmul.f32 %v2262_v8, %v571_v58 }
  0xfc   : > { %v912_v11 = vadd.f32 %v2285_v23, %v876_v63 }
  0xfd   : > { %1584 = vmatpush.bf16.msra.mxu3 %v1918_v61  ;;  %v685_v42 = vadd.f32 %v653_v31, %v491_v33 }
  0xfe   : > { %v563_v59 = vpop.permute.xlu1 %562  ;;  %v944_v16 = vmax.f32 %v912_v11, 0.0 }
  0xff   : > { %v651_v3 = vmul.f32 %v2262_v8, %v563_v59 }
 0x100   : > { %1999 = vset.pattern.permute.xlu1 %v2035_v0 }
 0x101   : > { %v683_v5 = vadd.f32 %v651_v3, %v489_v62  ;;  %606 = vperm.xlu1 %1999, %v306_v52  }
 0x103   : > { %v877_v7 = vadd.f32 %v845_v4, %v683_v5  ;;  %2000 = vset.pattern.permute.xlu2 %v2035_v0  ;;  %v2483_v14 = vpop.permute.xlu2 %397 }
 0x104   : > { %610 = vperm.xlu2 %2000, %v2388_v10  }
 0x105   : > { %v913_v6 = vadd.f32 %v2285_v23, %v877_v7 }
 0x107   : > { %v388_v15 = vpop.permute.xlu1 %387  ;;  %v945_v17 = vmax.f32 %v913_v6, 0.0 }
 0x108   : > { %v490_v25 = vmul.f32 %v2267_v9, %v388_v15  ;;  %v492_v15 = vmul.f32 %v2267_v9, %v2483_v14 }
 0x109   : > { %2001 = vset.pattern.permute.xlu1 %v2037_v2  ;;  %v970_v18 = vpack.c.bf16 %v945_v17, %v944_v16 }
 0x10a   : > { %800 = vperm.xlu1 %2001, %v306_v52  }
 0x10b   : > { %1120 = vmatmul.bf16.gmra.mxu0 %v970_v18  ;;  %1209 = vmatmul.bf16.gmra.mxu1 %v970_v18 }
 0x10c   : > { %2002 = vset.pattern.permute.xlu2 %v2037_v2  ;;  %v579_v21 = vpop.permute.xlu2 %578 }
 0x10d   : > { %804 = vperm.xlu2 %2002, %v2388_v10   ;;  %v996_v10 = vld [vmem:[%s2802_s4] sm:$0x3]  ;;  %v655_v56 = vmul.f32 %v2262_v8, %v579_v21 }
 0x10e   : > { %v2502_v32 = vperm.slane %v996_v10, 0  ;;  %v2508_v34 = vperm.slane %v996_v10, 1 }
 0x10f   : > { %v687_v3 = vadd.f32 %v655_v56, %v493_v57 }
 0x110   : > { %v567_v20 = vpop.permute.xlu1 %566 }
 0x111   : > { %v652_v22 = vmul.f32 %v2262_v8, %v567_v20 }
 0x112   : > { %2003 = vset.pattern.permute.xlu1 %v2036_v1 }
 0x113   : > { %452 = vperm.xlu1 %2003, %v2444_v45   ;;  %v1091_v26 = vpop.f32.mrf.mxu0  ;;  %v1180_v28 = vpop.f32.mrf.mxu1  ;;  %v684_v29 = vadd.f32 %v652_v22, %v490_v25 }
 0x114   : > { %v1092_v38 = vadd.f32 %v1091_v26, %v2502_v32  ;;  %v1181_v43 = vadd.f32 %v1180_v28, %v2508_v34 }
 0x115   : > { %2004 = vset.pattern.permute.xlu2 %v2035_v0  ;;  %v878_v37 = vadd.f32 %v846_v30, %v684_v29 }
 0x116   : > { %614 = vperm.xlu2 %2004, %v2413_v27   ;;  %v773_v41 = vpop.permute.xlu2 %772  ;;  %v1260_v51 = vmax.f32 %v1092_v38, 0.0  ;;  %v1261_v52 = vmax.f32 %v1181_v43, 0.0 }
 0x117   : > { %v914_v50 = vadd.f32 %v2285_v23, %v878_v37  ;;  %v849_v4 = vmul.f32 %v2272_v12, %v773_v41 }
 0x119   : > { %v765_v39 = vpop.permute.xlu1 %764  ;;  %v881_v6 = vadd.f32 %v849_v4, %v687_v3 }
 0x11a   : > { %v847_v36 = vmul.f32 %v2272_v12, %v765_v39 }
 0x11b   : > { %2006 = vset.pattern.permute.xlu1 %v2037_v2  ;;  %v1093_v44 = vpop.f32.mrf.mxu0  ;;  %v1182_v46 = vpop.f32.mrf.mxu1  ;;  %v917_v24 = vadd.f32 %v2285_v23, %v881_v6 }
 0x11c   : > { %v879_v47 = vadd.f32 %v847_v36, %v685_v42  ;;  %v1094_v48 = vadd.f32 %v1093_v44, %v2502_v32  ;;  %v1183_v49 = vadd.f32 %v1182_v46, %v2508_v34  ;;  %808 = vperm.xlu1 %2006, %v2413_v27   ;;  %v946_v27 = vmax.f32 %v914_v50, 0.0 }
 0x11d   : > { %v949_v38 = vmax.f32 %v917_v24, 0.0 }
 0x11e   : > { %v1262_v53 = vmax.f32 %v1094_v48, 0.0  ;;  %v1263_v54 = vmax.f32 %v1183_v49, 0.0  ;;  %v915_v55 = vadd.f32 %v2285_v23, %v879_v47  ;;  %2007 = vset.pattern.permute.xlu2 %v2037_v2 }
 0x11f   : > { %812 = vperm.xlu2 %2007, %v2444_v45   ;;  %v583_v5 = vpop.permute.xlu2 %582  ;;  %v408_v45 = vpop.permute.xlu0 %407 }
 0x120   : > { %v1324_v58 = vpack.c.bf16 %v1262_v53, %v1260_v51  ;;  %v1325_v59 = vpack.c.bf16 %v1263_v54, %v1261_v52  ;;  %v947_v60 = vmax.f32 %v915_v55, 0.0  ;;  %v494_v49 = vmul.f32 %v2267_v9, %v408_v45  ;;  %v313_v52 = vld [vmem:[%s2097_s30 + $0xf8] sm:$0xff] }
 0x121   : > { %v656_v50 = vmul.f32 %v2262_v8, %v583_v5 }
 0x122   : > { %v575_v61 = vpop.permute.xlu1 %574  ;;  %1496 = vmatmul.bf16.vlgmr.msra.gmra.mxu2 %v1324_v58  ;;  %1585 = vmatmul.bf16.vlgmr.msra.gmra.mxu3 %v1325_v59  ;;  %v971_v62 = vpack.c.bf16 %v947_v60, %v946_v27 }
 0x123   : > { %v654_v11 = vmul.f32 %v2262_v8, %v575_v61  ;;  %v688_v53 = vadd.f32 %v656_v50, %v494_v49 }
 0x124   : > { %2008 = vset.pattern.permute.xlu1 %v2036_v1  ;;  %v1096_v63 = vpop.f32.mrf.mxu0  ;;  %1125 = vmatmul.bf16.gmra.mxu0 %v971_v62 }
 0x125   : > { %v1185_v7 = vpop.f32.mrf.mxu1  ;;  %1214 = vmatmul.bf16.gmra.mxu1 %v971_v62  ;;  %457 = vperm.xlu1 %2008, %v2481_v13   ;;  %v1097_v16 = vadd.f32 %v1096_v63, %v2502_v32  ;;  %v686_v18 = vadd.f32 %v654_v11, %v492_v15 }
 0x126   : > { %v1186_v20 = vadd.f32 %v1185_v7, %v2508_v34 }
 0x127   : > { %2009 = vset.pattern.permute.xlu2 %v2036_v1  ;;  %v1264_v29 = vmax.f32 %v1097_v16, 0.0  ;;  %v587_v42 = vpop.permute.xlu0 %586 }
 0x128   : > { %462 = vperm.xlu2 %2009, %v2490_v19   ;;  %v781_v14 = vpop.permute.xlu2 %780  ;;  %v1265_v33 = vmax.f32 %v1186_v20, 0.0  ;;  %v657_v41 = vmul.f32 %v2262_v8, %v587_v42 }
 0x129   : > { %v851_v40 = vmul.f32 %v2272_v12, %v781_v14 }
 0x12b   : > { %v769_v17 = vpop.permute.xlu1 %768 }
 0x12c   : > { %v848_v21 = vmul.f32 %v2272_v12, %v769_v17  ;;  %v1098_v22 = vpop.f32.mrf.mxu0 }
 0x12d   : > { %v1099_v25 = vadd.f32 %v1098_v22, %v2502_v32  ;;  %v1187_v10 = vpop.f32.mrf.mxu1  ;;  %2010 = vset.pattern.permute.xlu1 %v2035_v0 }
 0x12e   : > { %v880_v26 = vadd.f32 %v848_v21, %v686_v18  ;;  %v1188_v28 = vadd.f32 %v1187_v10, %v2508_v34  ;;  %626 = vperm.xlu1 %2010, %v2490_v19  }
 0x12f   : > { %v1266_v30 = vmax.f32 %v1099_v25, 0.0  ;;  %v591_v17 = vpop.permute.xlu0 %590 }
 0x130   : > { %v1267_v31 = vmax.f32 %v1188_v28, 0.0  ;;  %v916_v37 = vadd.f32 %v2285_v23, %v880_v26  ;;  %2011 = vset.pattern.permute.xlu2 %v2037_v2  ;;  %v658_v21 = vmul.f32 %v2262_v8, %v591_v17 }
 0x131   : > { %v1326_v39 = vpack.c.bf16 %v1266_v30, %v1264_v29  ;;  %816 = vperm.xlu2 %2011, %v2481_v13   ;;  %v423_v47 = vpop.permute.xlu2 %422 }
 0x132   : > { %v1327_v43 = vpack.c.bf16 %v1267_v31, %v1265_v33  ;;  %v948_v36 = vmax.f32 %v916_v37, 0.0  ;;  %v497_v26 = vmul.f32 %v2267_v9, %v423_v47 }
 0x133   : > { %1501 = vmatmul.bf16.gmra.mxu2 %v1326_v39 }
 0x134   : > { %1590 = vmatmul.bf16.gmra.mxu3 %v1327_v43  ;;  %v413_v19 = vpop.permute.xlu1 %412  ;;  %v972_v44 = vpack.c.bf16 %v949_v38, %v948_v36 }
 0x135   : > { %v495_v46 = vmul.f32 %v2267_v9, %v413_v19 }
 0x136   : > { %2013 = vset.pattern.permute.xlu1 %v2036_v1  ;;  %1130 = vmatmul.bf16.gmra.mxu0 %v972_v44 }
 0x137   : > { %1219 = vmatmul.bf16.gmra.mxu1 %v972_v44  ;;  %467 = vperm.xlu1 %2013, %v2512_v35   ;;  %v1101_v48 = vpop.f32.mrf.mxu0  ;;  %v1190_v13 = vpop.f32.mrf.mxu1  ;;  %v689_v51 = vadd.f32 %v657_v41, %v495_v46 }
 0x138   : > { %v1102_v55 = vadd.f32 %v1101_v48, %v2502_v32  ;;  %v1191_v57 = vadd.f32 %v1190_v13, %v2508_v34  ;;  %v789_v25 = vpop.permute.xlu0 %788 }
 0x139   : > { %2014 = vset.pattern.permute.xlu2 %v2036_v1  ;;  %v883_v54 = vadd.f32 %v851_v40, %v689_v51  ;;  %v853_v30 = vmul.f32 %v2272_v12, %v789_v25 }
 0x13a   : > { %472 = vperm.xlu2 %2014, %v313_v52   ;;  %v1268_v63 = vmax.f32 %v1102_v55, 0.0  ;;  %v785_v3 = vpop.permute.xlu2 %784  ;;  %v1269_v4 = vmax.f32 %v1191_v57, 0.0 }
 0x13b   : > { %v919_v1 = vadd.f32 %v2285_v23, %v883_v54  ;;  %v852_v24 = vmul.f32 %v2272_v12, %v785_v3 }
 0x13d   : > { %v777_v56 = vpop.permute.xlu1 %776  ;;  %v951_v16 = vmax.f32 %v919_v1, 0.0 }
 0x13e   : > { %v850_v58 = vmul.f32 %v2272_v12, %v777_v56 }
 0x13f   : > { %2015 = vset.pattern.permute.xlu1 %v2035_v0  ;;  %v1103_v59 = vpop.f32.mrf.mxu0  ;;  %v1192_v27 = vpop.f32.mrf.mxu1 }
 0x140   : > { %v882_v60 = vadd.f32 %v850_v58, %v688_v53  ;;  %v1104_v61 = vadd.f32 %v1103_v59, %v2502_v32  ;;  %v1193_v62 = vadd.f32 %v1192_v27, %v2508_v34  ;;  %630 = vperm.xlu1 %2015, %v2512_v35   ;;  %v793_v58 = vpop.permute.xlu0 %792 }
 0x142   : > { %v1270_v5 = vmax.f32 %v1104_v61, 0.0  ;;  %v1271_v7 = vmax.f32 %v1193_v62, 0.0  ;;  %v918_v45 = vadd.f32 %v2285_v23, %v882_v60  ;;  %2016 = vset.pattern.permute.xlu2 %v2035_v0  ;;  %v854_v61 = vmul.f32 %v2272_v12, %v793_v58 }
 0x143   : > { %634 = vperm.xlu2 %2016, %v313_v52   ;;  %v433_v0 = vpop.permute.xlu2 %432 }
 0x144   : > { %v1328_v11 = vpack.c.bf16 %v1270_v5, %v1268_v63  ;;  %v1329_v6 = vpack.c.bf16 %v1271_v7, %v1269_v4  ;;  %v950_v15 = vmax.f32 %v918_v45, 0.0  ;;  %v499_v62 = vmul.f32 %v2267_v9, %v433_v0 }
 0x146   : > { %v418_v18 = vpop.permute.xlu1 %417  ;;  %1506 = vmatmul.bf16.gmra.mxu2 %v1328_v11  ;;  %1595 = vmatmul.bf16.gmra.mxu3 %v1329_v6  ;;  %v973_v35 = vpack.c.bf16 %v951_v16, %v950_v15 }
 0x147   : > { %v496_v20 = vmul.f32 %v2267_v9, %v418_v18 }
 0x148   : > { %2017 = vset.pattern.permute.xlu1 %v2037_v2  ;;  %1135 = vmatmul.bf16.gmra.mxu0 %v973_v35  ;;  %v443_v0 = vpop.permute.xlu0 %442 }
 0x149   : > { %1224 = vmatmul.bf16.gmra.mxu1 %v973_v35  ;;  %828 = vperm.xlu1 %2017, %v313_v52   ;;  %v690_v22 = vadd.f32 %v658_v21, %v496_v20 }
 0x14b   : > { %v884_v28 = vadd.f32 %v852_v24, %v690_v22 }
 0x14c   : > { %v603_v2 = vpop.permute.xlu2 %602 }
 0x14d   : > { %v920_v38 = vadd.f32 %v2285_v23, %v884_v28  ;;  %v661_v1 = vmul.f32 %v2262_v8, %v603_v2 }
 0x14f   : > { %v595_v10 = vpop.permute.xlu1 %594  ;;  %v952_v41 = vmax.f32 %v920_v38, 0.0  ;;  %v693_v11 = vadd.f32 %v661_v1, %v499_v62  ;;  %v2606_v38 = vld [vmem:[%s2799_s1 + $0x2] ss:$0 sm:$0xff] }
 0x150   : > { %v659_v14 = vmul.f32 %v2262_v8, %v595_v10  ;;  %v1106_v29 = vpop.f32.mrf.mxu0 }
 0x151   : > { %v1195_v33 = vpop.f32.mrf.mxu1  ;;  %v1107_v42 = vadd.f32 %v1106_v29, %v2502_v32 }
 0x152   : > { %v691_v31 = vadd.f32 %v659_v14, %v497_v26  ;;  %v1196_v43 = vadd.f32 %v1195_v33, %v2508_v34  ;;  %v2600_v14 = vld [vmem:[%s2799_s1] ss:$0 sm:$0xff] }
 0x153   : > { %v1272_v49 = vmax.f32 %v1107_v42, 0.0  ;;  %v501_v29 = vmul.f32 %v2600_v14, %v443_v0  ;;  %v448_v42 = vpop.permute.xlu0 %447 }
 0x154   : > { %v885_v37 = vadd.f32 %v853_v30, %v691_v31  ;;  %v1273_v51 = vmax.f32 %v1196_v43, 0.0 }
 0x155   : > { %v438_v53 = vpop.permute.xlu2 %437 }
 0x156   : > { %v921_v39 = vadd.f32 %v2285_v23, %v885_v37 }
 0x158   : > { %v428_v36 = vpop.permute.xlu1 %427  ;;  %v1108_v19 = vpop.f32.mrf.mxu0  ;;  %v953_v44 = vmax.f32 %v921_v39, 0.0 }
 0x159   : > { %v1109_v46 = vadd.f32 %v1108_v19, %v2502_v32  ;;  %v1197_v47 = vpop.f32.mrf.mxu1  ;;  %v498_v59 = vmul.f32 %v2267_v9, %v428_v36  ;;  %v500_v19 = vmul.f32 %v2600_v14, %v438_v53 }
 0x15a   : > { %v1198_v48 = vadd.f32 %v1197_v47, %v2508_v34  ;;  %v974_v13 = vpack.c.bf16 %v953_v44, %v952_v41 }
 0x15b   : > { %v1274_v50 = vmax.f32 %v1109_v46, 0.0  ;;  %v619_v62 = vpop.permute.xlu0 %618 }
 0x15c   : > { %v1275_v40 = vmax.f32 %v1198_v48, 0.0  ;;  %1140 = vmatmul.bf16.gmra.mxu0 %v974_v13  ;;  %1229 = vmatmul.bf16.gmra.mxu1 %v974_v13 }
 0x15d   : > { %v1330_v52 = vpack.c.bf16 %v1274_v50, %v1272_v49  ;;  %v2616_v49 = vld [vmem:[%s2800_s2] ss:$0 sm:$0xff] }
 0x15e   : > { %v1331_v54 = vpack.c.bf16 %v1275_v40, %v1273_v51  ;;  %v611_v63 = vpop.permute.xlu2 %610 }
 0x15f   : > { %1511 = vmatmul.bf16.gmra.mxu2 %v1330_v52 }
 0x160   : > { %1600 = vmatmul.bf16.gmra.mxu3 %v1331_v54 }
 0x161   : > { %v599_v55 = vpop.permute.xlu1 %598 }
 0x162   : > { %v660_v56 = vmul.f32 %v2262_v8, %v599_v55  ;;  %v1111_v57 = vpop.f32.mrf.mxu0 }
 0x163   : > { %v1200_v27 = vpop.f32.mrf.mxu1  ;;  %v1112_v3 = vadd.f32 %v1111_v57, %v2502_v32 }
 0x164   : > { %v692_v60 = vadd.f32 %v660_v56, %v498_v59  ;;  %v1201_v5 = vadd.f32 %v1200_v27, %v2508_v34 }
 0x165   : > { %v1276_v18 = vmax.f32 %v1112_v3, 0.0 }
 0x166   : > { %v886_v4 = vadd.f32 %v854_v61, %v692_v60  ;;  %v1277_v20 = vmax.f32 %v1201_v5, 0.0 }
 0x167   : > { %v805_v30 = vpop.permute.xlu2 %804 }
 0x168   : > { %v922_v8 = vadd.f32 %v2285_v23, %v886_v4  ;;  %v857_v39 = vmul.f32 %v2606_v38, %v805_v30 }
 0x16a   : > { %v797_v7 = vpop.permute.xlu1 %796  ;;  %v1113_v45 = vpop.f32.mrf.mxu0  ;;  %v954_v26 = vmax.f32 %v922_v8, 0.0 }
 0x16b   : > { %v855_v6 = vmul.f32 %v2272_v12, %v797_v7  ;;  %v1114_v15 = vadd.f32 %v1113_v45, %v2502_v32  ;;  %v1202_v16 = vpop.f32.mrf.mxu1  ;;  %v2594_v12 = vld [vmem:[%s2799_s1 + $0x1] ss:$0 sm:$0xff] }
 0x16c   : > { %v1203_v17 = vadd.f32 %v1202_v16, %v2508_v34  ;;  %v663_v10 = vmul.f32 %v2594_v12, %v611_v63  ;;  %v665_v3 = vmul.f32 %v2594_v12, %v619_v62  ;;  %v502_v16 = vmul.f32 %v2600_v14, %v448_v42 }
 0x16d   : > { %v887_v9 = vadd.f32 %v855_v6, %v693_v11  ;;  %v1278_v35 = vmax.f32 %v1114_v15, 0.0 }
 0x16e   : > { %v1279_v21 = vmax.f32 %v1203_v17, 0.0  ;;  %v695_v37 = vadd.f32 %v663_v10, %v501_v29 }
 0x16f   : > { %v1332_v22 = vpack.c.bf16 %v1278_v35, %v1276_v18  ;;  %v923_v24 = vadd.f32 %v2285_v23, %v887_v9 }
 0x170   : > { %v1333_v25 = vpack.c.bf16 %v1279_v21, %v1277_v20  ;;  %v889_v36 = vadd.f32 %v857_v39, %v695_v37  ;;  %v615_v44 = vpop.permute.xlu2 %614 }
 0x171   : > { %1516 = vmatmul.bf16.gmra.mxu2 %v1332_v22  ;;  %v955_v28 = vmax.f32 %v923_v24, 0.0  ;;  %v664_v17 = vmul.f32 %v2594_v12, %v615_v44 }
 0x172   : > { %1605 = vmatmul.bf16.gmra.mxu3 %v1333_v25  ;;  %v925_v50 = vadd.f32 %v2616_v49, %v889_v36 }
 0x173   : > { %v607_v23 = vpop.permute.xlu1 %606  ;;  %v975_v33 = vpack.c.bf16 %v955_v28, %v954_v26  ;;  %v696_v8 = vadd.f32 %v664_v17, %v502_v16 }
 0x174   : > { %v1116_v31 = vpop.f32.mrf.mxu0  ;;  %v662_v43 = vmul.f32 %v2594_v12, %v607_v23  ;;  %v957_v59 = vmax.f32 %v925_v50, 0.0 }
 0x175   : > { %v1205_v2 = vpop.f32.mrf.mxu1  ;;  %1145 = vmatmul.bf16.gmra.mxu0 %v975_v33  ;;  %1234 = vmatmul.bf16.gmra.mxu1 %v975_v33  ;;  %v1117_v41 = vadd.f32 %v1116_v31, %v2502_v32 }
 0x176   : > { %v1206_v46 = vadd.f32 %v1205_v2, %v2508_v34  ;;  %v694_v13 = vadd.f32 %v662_v43, %v500_v19  ;;  %v623_v43 = vpop.permute.xlu0 %622 }
 0x177   : > { %v1280_v54 = vmax.f32 %v1117_v41, 0.0  ;;  %v666_v44 = vmul.f32 %v2594_v12, %v623_v43 }
 0x178   : > { %v1281_v57 = vmax.f32 %v1206_v46, 0.0 }
 0x179   : > { %v813_v7 = vpop.permute.xlu2 %812 }
 0x17a   : > { %v859_v15 = vmul.f32 %v2606_v38, %v813_v7 }
 0x17c   : > { %v801_v47 = vpop.permute.xlu1 %800  ;;  %v1118_v48 = vpop.f32.mrf.mxu0 }
 0x17d   : > { %v856_v51 = vmul.f32 %v2606_v38, %v801_v47  ;;  %v1119_v40 = vadd.f32 %v1118_v48, %v2502_v32  ;;  %v1207_v52 = vpop.f32.mrf.mxu1 }
 0x17e   : > { %v1208_v53 = vadd.f32 %v1207_v52, %v2508_v34 }
 0x17f   : > { %v888_v55 = vadd.f32 %v856_v51, %v694_v13  ;;  %v1282_v56 = vmax.f32 %v1119_v40, 0.0  ;;  %v821_v13 = vpop.permute.xlu0 %820 }
 0x180   : > { %v1283_v58 = vmax.f32 %v1208_v53, 0.0 }
 0x181   : > { %v924_v27 = vadd.f32 %v2616_v49, %v888_v55  ;;  %v1334_v60 = vpack.c.bf16 %v1282_v56, %v1280_v54  ;;  %v861_v54 = vmul.f32 %v2606_v38, %v821_v13  ;;  %v2644_v56 = vld [vmem:[%s2804_s6] ss:$0 sm:$0xff] }
 0x182   : > { %v1335_v61 = vpack.c.bf16 %v1283_v58, %v1281_v57  ;;  %v463_v0 = vpop.permute.xlu2 %462 }
 0x183   : > { %v956_v1 = vmax.f32 %v924_v27, 0.0  ;;  %1521 = vmatmul.bf16.gmra.mxu2 %v1334_v60  ;;  %v505_v51 = vmul.f32 %v2600_v14, %v463_v0 }
 0x184   : > { %1610 = vmatmul.bf16.gmra.mxu3 %v1335_v61 }
 0x185   : > { %v453_v63 = vpop.permute.xlu1 %452  ;;  %v976_v4 = vpack.c.bf16 %v957_v59, %v956_v1 }
 0x186   : > { %v503_v5 = vmul.f32 %v2600_v14, %v453_v63 }
 0x187   : > { %1150 = vmatmul.bf16.gmra.mxu0 %v976_v4  ;;  %1239 = vmatmul.bf16.gmra.mxu1 %v976_v4 }
 0x188   : > { %v1121_v45 = vpop.f32.mrf.mxu0  ;;  %v1210_v11 = vpop.f32.mrf.mxu1  ;;  %v697_v6 = vadd.f32 %v665_v3, %v503_v5 }
 0x189   : > { %v1122_v9 = vadd.f32 %v1121_v45, %v2502_v32  ;;  %v1211_v20 = vadd.f32 %v1210_v11, %v2508_v34 }
 0x18a   : > { %v891_v18 = vadd.f32 %v859_v15, %v697_v6 }
 0x18b   : > { %v1284_v29 = vmax.f32 %v1122_v9, 0.0  ;;  %v1285_v30 = vmax.f32 %v1211_v20, 0.0  ;;  %v817_v46 = vpop.permute.xlu2 %816 }
 0x18c   : > { %v927_v25 = vadd.f32 %v2616_v49, %v891_v18  ;;  %v860_v48 = vmul.f32 %v2606_v38, %v817_v46 }
 0x18e   : > { %v809_v35 = vpop.permute.xlu1 %808  ;;  %v959_v2 = vmax.f32 %v927_v25, 0.0 }
 0x18f   : > { %v858_v21 = vmul.f32 %v2606_v38, %v809_v35 }
 0x190   : > { %v1123_v22 = vpop.f32.mrf.mxu0  ;;  %v1212_v24 = vpop.f32.mrf.mxu1 }
 0x191   : > { %v890_v10 = vadd.f32 %v858_v21, %v696_v8  ;;  %v1124_v26 = vadd.f32 %v1123_v22, %v2502_v32  ;;  %v1213_v28 = vadd.f32 %v1212_v24, %v2508_v34 }
 0x193   : > { %v926_v23 = vadd.f32 %v2616_v49, %v890_v10  ;;  %v1286_v33 = vmax.f32 %v1124_v26, 0.0  ;;  %v1287_v31 = vmax.f32 %v1213_v28, 0.0 }
 0x194   : > { %v473_v15 = vpop.permute.xlu2 %472 }
 0x195   : > { %v958_v37 = vmax.f32 %v926_v23, 0.0  ;;  %v1336_v39 = vpack.c.bf16 %v1286_v33, %v1284_v29  ;;  %v1337_v42 = vpack.c.bf16 %v1287_v31, %v1285_v30  ;;  %v825_v23 = vpop.permute.xlu0 %824 }
 0x196   : > { %v862_v43 = vmul.f32 %v2606_v38, %v825_v23 }
 0x197   : > { %v458_v36 = vpop.permute.xlu1 %457  ;;  %1526 = vmatmul.bf16.gmra.mxu2 %v1336_v39  ;;  %1615 = vmatmul.bf16.gmra.mxu3 %v1337_v42  ;;  %v977_v19 = vpack.c.bf16 %v959_v2, %v958_v37  ;;  %v507_v42 = vmul.f32 %v2600_v14, %v473_v15 }
 0x198   : > { %v504_v41 = vmul.f32 %v2600_v14, %v458_v36 }
 0x199   : > { %1155 = vmatmul.bf16.gmra.mxu0 %v977_v19  ;;  %1244 = vmatmul.bf16.gmra.mxu1 %v977_v19 }
 0x19a   : > { %v698_v47 = vadd.f32 %v666_v44, %v504_v41 }
 0x19c   : > { %v892_v40 = vadd.f32 %v860_v48, %v698_v47 }
 0x19d   : > { %v635_v33 = vpop.permute.xlu2 %634 }
 0x19e   : > { %v928_v58 = vadd.f32 %v2616_v49, %v892_v40  ;;  %v669_v36 = vmul.f32 %v2594_v12, %v635_v33 }
 0x1a0   : > { %v627_v50 = vpop.permute.xlu1 %626  ;;  %v960_v3 = vmax.f32 %v928_v58, 0.0  ;;  %v701_v13 = vadd.f32 %v669_v36, %v507_v42 }
 0x1a1   : > { %v667_v52 = vmul.f32 %v2594_v12, %v627_v50  ;;  %v1126_v53 = vpop.f32.mrf.mxu0 }
 0x1a2   : > { %v1215_v55 = vpop.f32.mrf.mxu1  ;;  %v1127_v1 = vadd.f32 %v1126_v53, %v2502_v32 }
 0x1a3   : > { %v699_v57 = vadd.f32 %v667_v52, %v505_v51  ;;  %v1216_v4 = vadd.f32 %v1215_v55, %v2508_v34 }
 0x1a4   : > { %v1288_v18 = vmax.f32 %v1127_v1, 0.0 }
 0x1a5   : > { %v893_v59 = vadd.f32 %v861_v54, %v699_v57  ;;  %v1497_v27 = vpop.f32.mrf.mxu2  ;;  %v1586_v60 = vpop.f32.mrf.mxu3  ;;  %v1289_v35 = vmax.f32 %v1216_v4, 0.0 }
 0x1a6   : > { %v1498_v61 = vadd.f32 %v2644_v56, %v1497_v27 }
 0x1a7   : > { %v929_v62 = vadd.f32 %v2616_v49, %v893_v59 }
 0x1a8   : > { %v1587_v63 = vadd.f32 %v1586_v60, %v1498_v61 }
 0x1a9   : > { %v961_v5 = vmax.f32 %v929_v62, 0.0  ;;  %v468_v7 = vpop.permute.xlu1 %467  ;;  %v1128_v45 = vpop.f32.mrf.mxu0 }
 0x1aa   : > { %1667 = vst.msk [vmem:[%s2653_s11] sm:$0xff] %vm1666_vm0, %v1587_v63  ;;  %v1129_v11 = vadd.f32 %v1128_v45, %v2502_v32  ;;  %v1217_v6 = vpop.f32.mrf.mxu1  ;;  %v506_v29 = vmul.f32 %v2600_v14, %v468_v7 }
 0x1ab   : > { %v1218_v16 = vadd.f32 %v1217_v6, %v2508_v34  ;;  %v978_v17 = vpack.c.bf16 %v961_v5, %v960_v3 }
 0x1ac   : > { %v1290_v9 = vmax.f32 %v1129_v11, 0.0 }
 0x1ad   : > { %v1291_v8 = vmax.f32 %v1218_v16, 0.0  ;;  %1160 = vmatmul.bf16.gmra.mxu0 %v978_v17  ;;  %1249 = vmatmul.bf16.gmra.mxu1 %v978_v17  ;;  %v1499_v20 = vpop.f32.mrf.mxu2  ;;  %v1588_v21 = vpop.f32.mrf.mxu3 }
 0x1ae   : > { %v1500_v0 = vadd.f32 %v2644_v56, %v1499_v20  ;;  %v1338_v22 = vpack.c.bf16 %v1290_v9, %v1288_v18 }
 0x1af   : > { %v1339_v24 = vpack.c.bf16 %v1291_v8, %v1289_v35 }
 0x1b0   : > { %v1589_v25 = vadd.f32 %v1588_v21, %v1500_v0  ;;  %1531 = vmatmul.bf16.gmra.mxu2 %v1338_v22 }
 0x1b1   : > { %1620 = vmatmul.bf16.gmra.mxu3 %v1339_v24 }
 0x1b2   : > { %1668 = vst.msk [vmem:[%s2653_s11 + $0x8] sm:$0xff] %vm1666_vm0, %v1589_v25  ;;  %v631_v10 = vpop.permute.xlu1 %630 }
 0x1b3   : > { %v668_v26 = vmul.f32 %v2594_v12, %v631_v10  ;;  %v1131_v28 = vpop.f32.mrf.mxu0 }
 0x1b4   : > { %v1220_v30 = vpop.f32.mrf.mxu1  ;;  %v1132_v44 = vadd.f32 %v1131_v28, %v2502_v32 }
 0x1b5   : > { %v700_v31 = vadd.f32 %v668_v26, %v506_v29  ;;  %v1221_v46 = vadd.f32 %v1220_v30, %v2508_v34 }
 0x1b6   : > { %v1502_v2 = vpop.f32.mrf.mxu2  ;;  %v1292_v52 = vmax.f32 %v1132_v44, 0.0 }
 0x1b7   : > { %v1503_v37 = vadd.f32 %v2644_v56, %v1502_v2  ;;  %v1591_v39 = vpop.f32.mrf.mxu3  ;;  %v894_v41 = vadd.f32 %v862_v43, %v700_v31  ;;  %v1293_v57 = vmax.f32 %v1221_v46, 0.0 }
 0x1b9   : > { %v1592_v19 = vadd.f32 %v1591_v39, %v1503_v37  ;;  %v930_v55 = vadd.f32 %v2616_v49, %v894_v41 }
 0x1bb   : > { %1669 = vst.msk [vmem:[%s2653_s11 + $0x10] sm:$0xff] %vm1666_vm0, %v1592_v19  ;;  %v829_v47 = vpop.permute.xlu1 %828  ;;  %v1133_v48 = vpop.f32.mrf.mxu0  ;;  %v962_v63 = vmax.f32 %v930_v55, 0.0 }
 0x1bc   : > { %v863_v50 = vmul.f32 %v2606_v38, %v829_v47  ;;  %v1134_v51 = vadd.f32 %v1133_v48, %v2502_v32  ;;  %v1222_v14 = vpop.f32.mrf.mxu1 }
 0x1bd   : > { %v1223_v40 = vadd.f32 %v1222_v14, %v2508_v34 }
 0x1be   : > { %v895_v12 = vadd.f32 %v863_v50, %v701_v13  ;;  %v1294_v53 = vmax.f32 %v1134_v51, 0.0  ;;  %v1504_v54 = vpop.f32.mrf.mxu2 }
 0x1bf   : > { %v1295_v58 = vmax.f32 %v1223_v40, 0.0  ;;  %v1505_v59 = vadd.f32 %v2644_v56, %v1504_v54  ;;  %v1593_v60 = vpop.f32.mrf.mxu3 }
 0x1c0   : > { %v931_v27 = vadd.f32 %v2616_v49, %v895_v12  ;;  %v1340_v38 = vpack.c.bf16 %v1294_v53, %v1292_v52 }
 0x1c1   : > { %v1594_v61 = vadd.f32 %v1593_v60, %v1505_v59  ;;  %v1341_v62 = vpack.c.bf16 %v1295_v58, %v1293_v57 }
 0x1c2   : > { %v963_v1 = vmax.f32 %v931_v27, 0.0  ;;  %1536 = vmatmul.bf16.gmra.mxu2 %v1340_v38 }
 0x1c3   : > { %1670 = vst.msk [vmem:[%s2653_s11 + $0x18] sm:$0xff] %vm1666_vm0, %v1594_v61  ;;  %1625 = vmatmul.bf16.gmra.mxu3 %v1341_v62 }
 0x1c4   : > { %v979_v3 = vpack.c.bf16 %v963_v1, %v962_v63 }
 0x1c5   : > { %v1136_v4 = vpop.f32.mrf.mxu0 }
 0x1c6   : > { %v1225_v5 = vpop.f32.mrf.mxu1  ;;  %1165 = vmatmul.bf16.gmra.mxu0 %v979_v3  ;;  %1254 = vmatmul.bf16.gmra.mxu1 %v979_v3  ;;  %v1137_v11 = vadd.f32 %v1136_v4, %v2502_v32 }
 0x1c7   : > { %v1226_v15 = vadd.f32 %v1225_v5, %v2508_v34 }
 0x1c8   : > { %v1296_v35 = vmax.f32 %v1137_v11, 0.0 }
 0x1c9   : > { %v1507_v7 = vpop.f32.mrf.mxu2  ;;  %v1596_v45 = vpop.f32.mrf.mxu3  ;;  %v1297_v20 = vmax.f32 %v1226_v15, 0.0 }
 0x1ca   : > { %v1508_v49 = vadd.f32 %v2644_v56, %v1507_v7 }
 0x1cc   : > { %v1597_v6 = vadd.f32 %v1596_v45, %v1508_v49 }
 0x1cd   : > { %v1138_v16 = vpop.f32.mrf.mxu0 }
 0x1ce   : > { %1671 = vst.msk [vmem:[%s2653_s11 + $0x20] sm:$0xff] %vm1666_vm0, %v1597_v6  ;;  %v1139_v17 = vadd.f32 %v1138_v16, %v2502_v32  ;;  %v1227_v18 = vpop.f32.mrf.mxu1 }
 0x1cf   : > { %v1228_v9 = vadd.f32 %v1227_v18, %v2508_v34 }
 0x1d0   : > { %v1298_v8 = vmax.f32 %v1139_v17, 0.0 }
 0x1d1   : > { %v1299_v21 = vmax.f32 %v1228_v9, 0.0  ;;  %v1509_v0 = vpop.f32.mrf.mxu2  ;;  %v1598_v25 = vpop.f32.mrf.mxu3 }
 0x1d2   : > { %v1510_v22 = vadd.f32 %v2644_v56, %v1509_v0  ;;  %v1342_v24 = vpack.c.bf16 %v1298_v8, %v1296_v35 }
 0x1d3   : > { %v1343_v10 = vpack.c.bf16 %v1299_v21, %v1297_v20 }
 0x1d4   : > { %v1599_v26 = vadd.f32 %v1598_v25, %v1510_v22  ;;  %1541 = vmatmul.bf16.gmra.mxu2 %v1342_v24 }
 0x1d5   : > { %1630 = vmatmul.bf16.gmra.mxu3 %v1343_v10 }
 0x1d6   : > { %1672 = vst.msk [vmem:[%s2653_s11 + $0x28] sm:$0xff] %vm1666_vm0, %v1599_v26 }
 0x1d9   : > { %v1141_v28 = vpop.f32.mrf.mxu0  ;;  %v1230_v29 = vpop.f32.mrf.mxu1 }
 0x1da   : > { %v1142_v30 = vadd.f32 %v1141_v28, %v2502_v32  ;;  %v1231_v23 = vadd.f32 %v1230_v29, %v2508_v34 }
 0x1dc   : > { %v1300_v36 = vmax.f32 %v1142_v30, 0.0  ;;  %v1301_v19 = vmax.f32 %v1231_v23, 0.0 }
 0x1e1   : > { %v1143_v33 = vpop.f32.mrf.mxu0  ;;  %v1232_v31 = vpop.f32.mrf.mxu1 }
 0x1e2   : > { %v1144_v2 = vadd.f32 %v1143_v33, %v2502_v32  ;;  %v1233_v37 = vadd.f32 %v1232_v31, %v2508_v34  ;;  %v1512_v39 = vpop.f32.mrf.mxu2 }
 0x1e3   : > { %v1513_v42 = vadd.f32 %v2644_v56, %v1512_v39  ;;  %v1601_v43 = vpop.f32.mrf.mxu3 }
 0x1e4   : > { %v1302_v41 = vmax.f32 %v1144_v2, 0.0  ;;  %v1303_v44 = vmax.f32 %v1233_v37, 0.0 }
 0x1e5   : > { %v1602_v46 = vadd.f32 %v1601_v43, %v1513_v42 }
 0x1e6   : > { %v1344_v47 = vpack.c.bf16 %v1302_v41, %v1300_v36  ;;  %v1345_v48 = vpack.c.bf16 %v1303_v44, %v1301_v19 }
 0x1e7   : > { %1673 = vst.msk [vmem:[%s2653_s11 + $0x30] sm:$0xff] %vm1666_vm0, %v1602_v46 }
 0x1e8   : > { %1546 = vmatmul.bf16.gmra.mxu2 %v1344_v47  ;;  %1635 = vmatmul.bf16.gmra.mxu3 %v1345_v48 }
 0x1ea   : > { %v1514_v13 = vpop.f32.mrf.mxu2 }
 0x1eb   : > { %v1515_v50 = vadd.f32 %v2644_v56, %v1514_v13  ;;  %v1603_v51 = vpop.f32.mrf.mxu3 }
 0x1ed   : > { %v1604_v14 = vadd.f32 %v1603_v51, %v1515_v50 }
 0x1ef   : > { %1674 = vst.msk [vmem:[%s2653_s11 + $0x38] sm:$0xff] %vm1666_vm0, %v1604_v14 }
 0x1f2   : > { %v1146_v40 = vpop.f32.mrf.mxu0  ;;  %v1235_v52 = vpop.f32.mrf.mxu1 }
 0x1f3   : > { %v1147_v57 = vadd.f32 %v1146_v40, %v2502_v32  ;;  %v1236_v58 = vadd.f32 %v1235_v52, %v2508_v34 }
 0x1f4   : > { %v1517_v12 = vpop.f32.mrf.mxu2 }
 0x1f5   : > { %v1518_v53 = vadd.f32 %v2644_v56, %v1517_v12  ;;  %v1606_v54 = vpop.f32.mrf.mxu3  ;;  %v1304_v61 = vmax.f32 %v1147_v57, 0.0  ;;  %v1305_v1 = vmax.f32 %v1236_v58, 0.0 }
 0x1f7   : > { %v1607_v55 = vadd.f32 %v1606_v54, %v1518_v53 }
 0x1f9   : > { %1675 = vst.msk [vmem:[%s2653_s11 + $0x40] sm:$0xff] %vm1666_vm0, %v1607_v55 }
 0x1fa   : > { %v1148_v59 = vpop.f32.mrf.mxu0  ;;  %v1237_v27 = vpop.f32.mrf.mxu1 }
 0x1fb   : > { %v1149_v60 = vadd.f32 %v1148_v59, %v2502_v32  ;;  %v1238_v38 = vadd.f32 %v1237_v27, %v2508_v34 }
 0x1fc   : > { %v1519_v62 = vpop.f32.mrf.mxu2 }
 0x1fd   : > { %v1306_v63 = vmax.f32 %v1149_v60, 0.0  ;;  %v1307_v3 = vmax.f32 %v1238_v38, 0.0  ;;  %v1520_v4 = vadd.f32 %v2644_v56, %v1519_v62  ;;  %v1608_v5 = vpop.f32.mrf.mxu3 }
 0x1ff   : > { %v1609_v7 = vadd.f32 %v1608_v5, %v1520_v4  ;;  %v1346_v45 = vpack.c.bf16 %v1306_v63, %v1304_v61  ;;  %v1347_v49 = vpack.c.bf16 %v1307_v3, %v1305_v1 }
 0x201   : > { %1676 = vst.msk [vmem:[%s2653_s11 + $0x48] sm:$0xff] %vm1666_vm0, %v1609_v7  ;;  %1551 = vmatmul.bf16.gmra.mxu2 %v1346_v45  ;;  %1640 = vmatmul.bf16.gmra.mxu3 %v1347_v49 }
 0x204   : > { %v1151_v11 = vpop.f32.mrf.mxu0  ;;  %v1240_v6 = vpop.f32.mrf.mxu1 }
 0x205   : > { %v1152_v9 = vadd.f32 %v1151_v11, %v2502_v32  ;;  %v1241_v35 = vadd.f32 %v1240_v6, %v2508_v34 }
 0x206   : > { %v1522_v15 = vpop.f32.mrf.mxu2 }
 0x207   : > { %v1523_v16 = vadd.f32 %v2644_v56, %v1522_v15  ;;  %v1611_v17 = vpop.f32.mrf.mxu3  ;;  %v1308_v22 = vmax.f32 %v1152_v9, 0.0  ;;  %v1309_v25 = vmax.f32 %v1241_v35, 0.0 }
 0x209   : > { %v1612_v18 = vadd.f32 %v1611_v17, %v1523_v16 }
 0x20b   : > { %1677 = vst.msk [vmem:[%s2653_s11 + $0x50] sm:$0xff] %vm1666_vm0, %v1612_v18 }
 0x20c   : > { %v1153_v8 = vpop.f32.mrf.mxu0  ;;  %v1242_v20 = vpop.f32.mrf.mxu1 }
 0x20d   : > { %v1154_v21 = vadd.f32 %v1153_v8, %v2502_v32  ;;  %v1243_v0 = vadd.f32 %v1242_v20, %v2508_v34 }
 0x20e   : > { %v1524_v24 = vpop.f32.mrf.mxu2 }
 0x20f   : > { %v1310_v10 = vmax.f32 %v1154_v21, 0.0  ;;  %v1311_v26 = vmax.f32 %v1243_v0, 0.0  ;;  %v1525_v28 = vadd.f32 %v2644_v56, %v1524_v24  ;;  %v1613_v29 = vpop.f32.mrf.mxu3 }
 0x211   : > { %v1348_v30 = vpack.c.bf16 %v1310_v10, %v1308_v22  ;;  %v1349_v23 = vpack.c.bf16 %v1311_v26, %v1309_v25  ;;  %v1614_v33 = vadd.f32 %v1613_v29, %v1525_v28 }
 0x213   : > { %1678 = vst.msk [vmem:[%s2653_s11 + $0x58] sm:$0xff] %vm1666_vm0, %v1614_v33  ;;  %1556 = vmatmul.bf16.gmra.mxu2 %v1348_v30  ;;  %1645 = vmatmul.bf16.gmra.mxu3 %v1349_v23 }
 0x216   : > { %v1156_v31 = vpop.f32.mrf.mxu0  ;;  %v1245_v2 = vpop.f32.mrf.mxu1 }
 0x217   : > { %v1157_v43 = vadd.f32 %v1156_v31, %v2502_v32  ;;  %v1246_v36 = vadd.f32 %v1245_v2, %v2508_v34 }
 0x219   : > { %v1312_v48 = vmax.f32 %v1157_v43, 0.0  ;;  %v1313_v13 = vmax.f32 %v1246_v36, 0.0 }
 0x21a   : > { %v1527_v37 = vpop.f32.mrf.mxu2  ;;  %v1616_v39 = vpop.f32.mrf.mxu3 }
 0x21b   : > { %v1528_v42 = vadd.f32 %v2644_v56, %v1527_v37 }
 0x21d   : > { %v1617_v19 = vadd.f32 %v1616_v39, %v1528_v42 }
 0x21e   : > { %v1158_v41 = vpop.f32.mrf.mxu0  ;;  %v1247_v44 = vpop.f32.mrf.mxu1 }
 0x21f   : > { %1679 = vst.msk [vmem:[%s2653_s11 + $0x60] sm:$0xff] %vm1666_vm0, %v1617_v19  ;;  %v1159_v46 = vadd.f32 %v1158_v41, %v2502_v32  ;;  %v1248_v47 = vadd.f32 %v1247_v44, %v2508_v34 }
 0x221   : > { %v1314_v50 = vmax.f32 %v1159_v46, 0.0  ;;  %v1315_v51 = vmax.f32 %v1248_v47, 0.0 }
 0x222   : > { %v1529_v14 = vpop.f32.mrf.mxu2  ;;  %v1618_v53 = vpop.f32.mrf.mxu3 }
 0x223   : > { %v1350_v40 = vpack.c.bf16 %v1314_v50, %v1312_v48  ;;  %v1351_v52 = vpack.c.bf16 %v1315_v51, %v1313_v13  ;;  %v1530_v12 = vadd.f32 %v2644_v56, %v1529_v14 }
 0x225   : > { %v1619_v54 = vadd.f32 %v1618_v53, %v1530_v12  ;;  %1561 = vmatmul.bf16.gmra.mxu2 %v1350_v40  ;;  %1650 = vmatmul.bf16.gmra.mxu3 %v1351_v52 }
 0x227   : > { %1680 = vst.msk [vmem:[%s2653_s11 + $0x68] sm:$0xff] %vm1666_vm0, %v1619_v54 }
 0x22a   : > { %v1161_v55 = vpop.f32.mrf.mxu0  ;;  %v1250_v57 = vpop.f32.mrf.mxu1 }
 0x22b   : > { %v1162_v58 = vadd.f32 %v1161_v55, %v2502_v32  ;;  %v1251_v59 = vadd.f32 %v1250_v57, %v2508_v34 }
 0x22d   : > { %v1316_v3 = vmax.f32 %v1162_v58, 0.0  ;;  %v1317_v4 = vmax.f32 %v1251_v59, 0.0 }
 0x232   : > { %v1163_v27 = vpop.f32.mrf.mxu0  ;;  %v1252_v60 = vpop.f32.mrf.mxu1 }
 0x233   : > { %v1164_v38 = vadd.f32 %v1163_v27, %v2502_v32  ;;  %v1253_v61 = vadd.f32 %v1252_v60, %v2508_v34  ;;  %v1532_v62 = vpop.f32.mrf.mxu2 }
 0x234   : > { %v1533_v1 = vadd.f32 %v2644_v56, %v1532_v62  ;;  %v1621_v63 = vpop.f32.mrf.mxu3 }
 0x235   : > { %v1318_v5 = vmax.f32 %v1164_v38, 0.0  ;;  %v1319_v7 = vmax.f32 %v1253_v61, 0.0 }
 0x236   : > { %v1622_v45 = vadd.f32 %v1621_v63, %v1533_v1 }
 0x237   : > { %v1352_v49 = vpack.c.bf16 %v1318_v5, %v1316_v3  ;;  %v1353_v11 = vpack.c.bf16 %v1319_v7, %v1317_v4 }
 0x238   : > { %1681 = vst.msk [vmem:[%s2653_s11 + $0x70] sm:$0xff] %vm1666_vm0, %v1622_v45 }
 0x239   : > { %1566 = vmatmul.bf16.gmra.mxu2 %v1352_v49  ;;  %1655 = vmatmul.bf16.gmra.mxu3 %v1353_v11 }
 0x23b   : > { %v1534_v6 = vpop.f32.mrf.mxu2 }
 0x23c   : > { %v1535_v15 = vadd.f32 %v2644_v56, %v1534_v6  ;;  %v1623_v16 = vpop.f32.mrf.mxu3 }
 0x23e   : > { %v1624_v17 = vadd.f32 %v1623_v16, %v1535_v15 }
 0x240   : > { %1682 = vst.msk [vmem:[%s2653_s11 + $0x78] sm:$0xff] %vm1666_vm0, %v1624_v17 }
 0x243   : > { %v1166_v18 = vpop.f32.mrf.mxu0  ;;  %v1255_v9 = vpop.f32.mrf.mxu1 }
 0x244   : > { %v1167_v0 = vadd.f32 %v1166_v18, %v2502_v32  ;;  %v1256_v22 = vadd.f32 %v1255_v9, %v2508_v34 }
 0x245   : > { %v1537_v35 = vpop.f32.mrf.mxu2 }
 0x246   : > { %v1538_v8 = vadd.f32 %v2644_v56, %v1537_v35  ;;  %v1626_v20 = vpop.f32.mrf.mxu3  ;;  %v1320_v28 = vmax.f32 %v1167_v0, 0.0  ;;  %v1321_v30 = vmax.f32 %v1256_v22, 0.0 }
 0x248   : > { %v1627_v21 = vadd.f32 %v1626_v20, %v1538_v8 }
 0x24a   : > { %1683 = vst.msk [vmem:[%s2653_s11 + $0x80] sm:$0xff] %vm1666_vm0, %v1627_v21 }
 0x24b   : > { %v1168_v24 = vpop.f32.mrf.mxu0  ;;  %v1257_v25 = vpop.f32.mrf.mxu1 }
 0x24c   : > { %v1169_v10 = vadd.f32 %v1168_v24, %v2502_v32  ;;  %v1258_v26 = vadd.f32 %v1257_v25, %v2508_v34 }
 0x24d   : > { %v1539_v29 = vpop.f32.mrf.mxu2 }
 0x24e   : > { %v1322_v23 = vmax.f32 %v1169_v10, 0.0  ;;  %v1323_v33 = vmax.f32 %v1258_v26, 0.0  ;;  %v1540_v31 = vadd.f32 %v2644_v56, %v1539_v29  ;;  %v1628_v2 = vpop.f32.mrf.mxu3 }
 0x250   : > { %v1354_v37 = vpack.c.bf16 %v1322_v23, %v1320_v28  ;;  %v1355_v39 = vpack.c.bf16 %v1323_v33, %v1321_v30  ;;  %v1629_v42 = vadd.f32 %v1628_v2, %v1540_v31 }
 0x252   : > { %1684 = vst.msk [vmem:[%s2653_s11 + $0x88] sm:$0xff] %vm1666_vm0, %v1629_v42  ;;  %1571 = vmatmul.bf16.gmra.mxu2 %v1354_v37  ;;  %1660 = vmatmul.bf16.gmra.mxu3 %v1355_v39 }
 0x257   : > { %v1542_v32 = vpop.f32.mrf.mxu2 }
 0x258   : > { %v1543_v34 = vadd.f32 %v2644_v56, %v1542_v32  ;;  %v1631_v43 = vpop.f32.mrf.mxu3 }
 0x25a   : > { %v1632_v36 = vadd.f32 %v1631_v43, %v1543_v34 }
 0x25c   : > { %1685 = vst.msk [vmem:[%s2653_s11 + $0x90] sm:$0xff] %vm1666_vm0, %v1632_v36 }
 0x25f   : > { %v1544_v19 = vpop.f32.mrf.mxu2 }
 0x260   : > { %v1545_v41 = vadd.f32 %v2644_v56, %v1544_v19  ;;  %v1633_v44 = vpop.f32.mrf.mxu3 }
 0x262   : > { %v1634_v46 = vadd.f32 %v1633_v44, %v1545_v41 }
 0x264   : > { %1686 = vst.msk [vmem:[%s2653_s11 + $0x98] sm:$0xff] %vm1666_vm0, %v1634_v46 }
 0x26b   : > { %v1547_v47 = vpop.f32.mrf.mxu2  ;;  %v1636_v48 = vpop.f32.mrf.mxu3 }
 0x26c   : > { %v1548_v13 = vadd.f32 %v2644_v56, %v1547_v47 }
 0x26e   : > { %v1637_v50 = vadd.f32 %v1636_v48, %v1548_v13 }
 0x270   : > { %1687 = vst.msk [vmem:[%s2653_s11 + $0xa0] sm:$0xff] %vm1666_vm0, %v1637_v50 }
 0x273   : > { %v1549_v51 = vpop.f32.mrf.mxu2  ;;  %v1638_v40 = vpop.f32.mrf.mxu3 }
 0x274   : > { %v1550_v14 = vadd.f32 %v2644_v56, %v1549_v51 }
 0x276   : > { %v1639_v52 = vadd.f32 %v1638_v40, %v1550_v14 }
 0x278   : > { %1688 = vst.msk [vmem:[%s2653_s11 + $0xa8] sm:$0xff] %vm1666_vm0, %v1639_v52 }
 0x284   : > { %v1552_v12 = vpop.f32.mrf.mxu2  ;;  %v1641_v53 = vpop.f32.mrf.mxu3 }
 0x285   : > { %v1553_v54 = vadd.f32 %v2644_v56, %v1552_v12 }
 0x287   : > { %v1642_v55 = vadd.f32 %v1641_v53, %v1553_v54 }
 0x289   : > { %1689 = vst.msk [vmem:[%s2653_s11 + $0xb0] sm:$0xff] %vm1666_vm0, %v1642_v55 }
 0x28c   : > { %v1554_v57 = vpop.f32.mrf.mxu2  ;;  %v1643_v59 = vpop.f32.mrf.mxu3 }
 0x28d   : > { %v1555_v58 = vadd.f32 %v2644_v56, %v1554_v57 }
 0x28f   : > { %v1644_v27 = vadd.f32 %v1643_v59, %v1555_v58 }
 0x291   : > { %1690 = vst.msk [vmem:[%s2653_s11 + $0xb8] sm:$0xff] %vm1666_vm0, %v1644_v27 }
 0x296   : > { %v1557_v60 = vpop.f32.mrf.mxu2  ;;  %v1646_v38 = vpop.f32.mrf.mxu3 }
 0x297   : > { %v1558_v61 = vadd.f32 %v2644_v56, %v1557_v60 }
 0x299   : > { %v1647_v62 = vadd.f32 %v1646_v38, %v1558_v61 }
 0x29b   : > { %1691 = vst.msk [vmem:[%s2653_s11 + $0xc0] sm:$0xff] %vm1666_vm0, %v1647_v62 }
 0x29e   : > { %v1559_v1 = vpop.f32.mrf.mxu2  ;;  %v1648_v3 = vpop.f32.mrf.mxu3 }
 0x29f   : > { %v1560_v63 = vadd.f32 %v2644_v56, %v1559_v1 }
 0x2a1   : > { %v1649_v4 = vadd.f32 %v1648_v3, %v1560_v63 }
 0x2a3   : > { %1692 = vst.msk [vmem:[%s2653_s11 + $0xc8] sm:$0xff] %vm1666_vm0, %v1649_v4 }
 0x2a8   : > { %v1562_v5 = vpop.f32.mrf.mxu2  ;;  %v1651_v7 = vpop.f32.mrf.mxu3 }
 0x2a9   : > { %v1563_v45 = vadd.f32 %v2644_v56, %v1562_v5 }
 0x2ab   : > { %v1652_v49 = vadd.f32 %v1651_v7, %v1563_v45 }
 0x2ad   : > { %1693 = vst.msk [vmem:[%s2653_s11 + $0xd0] sm:$0xff] %vm1666_vm0, %v1652_v49 }
 0x2b0   : > { %v1564_v11 = vpop.f32.mrf.mxu2  ;;  %v1653_v15 = vpop.f32.mrf.mxu3 }
 0x2b1   : > { %v1565_v6 = vadd.f32 %v2644_v56, %v1564_v11 }
 0x2b3   : > { %v1654_v16 = vadd.f32 %v1653_v15, %v1565_v6 }
 0x2b5   : > { %1694 = vst.msk [vmem:[%s2653_s11 + $0xd8] sm:$0xff] %vm1666_vm0, %v1654_v16 }
 0x2bc   : > { %v1567_v17 = vpop.f32.mrf.mxu2  ;;  %v1656_v18 = vpop.f32.mrf.mxu3 }
 0x2bd   : > { %v1568_v9 = vadd.f32 %v2644_v56, %v1567_v17 }
 0x2bf   : > { %v1657_v35 = vadd.f32 %v1656_v18, %v1568_v9 }
 0x2c1   : > { %1695 = vst.msk [vmem:[%s2653_s11 + $0xe0] sm:$0xff] %vm1666_vm0, %v1657_v35 }
 0x2c4   : > { %v1569_v8 = vpop.f32.mrf.mxu2  ;;  %v1658_v21 = vpop.f32.mrf.mxu3 }
 0x2c5   : > { %v1570_v20 = vadd.f32 %v2644_v56, %v1569_v8 }
 0x2c7   : > { %v1659_v0 = vadd.f32 %v1658_v21, %v1570_v20 }
 0x2c9   : > { %1696 = vst.msk [vmem:[%s2653_s11 + $0xe8] sm:$0xff] %vm1666_vm0, %v1659_v0 }
 0x2d5   : > { %v1572_v22 = vpop.f32.mrf.mxu2  ;;  %v1661_v24 = vpop.f32.mrf.mxu3 }
 0x2d6   : > { %v1573_v25 = vadd.f32 %v2644_v56, %v1572_v22 }
 0x2d8   : > { %v1662_v10 = vadd.f32 %v1661_v24, %v1573_v25 }
 0x2da   : > { %1697 = vst.msk [vmem:[%s2653_s11 + $0xf0] sm:$0xff] %vm1666_vm0, %v1662_v10 }
 0x2dd   : > { %v1574_v26 = vpop.f32.mrf.mxu2  ;;  %v1663_v29 = vpop.f32.mrf.mxu3 }
 0x2de   : > { %v1575_v28 = vadd.f32 %v2644_v56, %v1574_v26 }
 0x2e0   : > { %v1664_v30 = vadd.f32 %v1663_v29, %v1575_v28 }
 0x2e2   : > { %1698 = vst.msk [vmem:[%s2653_s11 + $0xf8] sm:$0xff] %vm1666_vm0, %v1664_v30 }
 0x2e3 PF: > { %s17_s24 = sadd.s32 1, %s2033_s24  }
 0x2e4   : > { %p14_p4 = scmp.ge.s32.totalorder %s17_s24, 6  }
 0x2e6   :  { %16 = sbr.rel (!%p14_p4) target bundleno = 1 (0x1), region = 78 }

</bundles_post_ra>
